<compile_context>
chip_gen: v7x
topology: tpu7x:2x2x1
jax: 0.10.0
libtpu: 0.0.40
codegen_flags: <defaults>
</compile_context>

<pallas_src>
import functools
import math

import jax
import jax.numpy as jnp
from jax.experimental import pallas as pl
from jax.experimental.pallas import tpu as pltpu


def _softmax_last(x):
    # f32 softmax; division goes through the EUP reciprocal (frees VALU slots).
    m = jnp.max(x, axis=-1, keepdims=True)
    e = jnp.exp(x - m)
    s = jnp.sum(e, axis=-1, keepdims=True)
    return e * pl.reciprocal(s, approx=True)


def attention_kernel(hs_ref, fl_ref,
                     wq_ref, bq_ref, wk_ref, bk_ref, wv_ref, bv_ref,
                     wo_ref, bo_ref, o_ref, *, num_heads, head_dim):
    d = num_heads * head_dim

    hs = hs_ref[0]            # (Sq, D) in the input dtype
    fl = fl_ref[0]            # (Sf, D)
    dt = hs.dtype             # MXU-operand dtype for the attention stages
    sq = hs.shape[0]

    # --- Projections (MXU, f32 accumulate). Separate matmuls for hs / fl so no
    #     concat copy and no sublane-axis splits later.
    q  = jnp.dot(hs, wq_ref[...], preferred_element_type=jnp.float32) + bq_ref[...]
    k  = jnp.dot(hs, wk_ref[...], preferred_element_type=jnp.float32) + bk_ref[...]
    v  = jnp.dot(hs, wv_ref[...], preferred_element_type=jnp.float32) + bv_ref[...]
    kt = jnp.dot(fl, wk_ref[...], preferred_element_type=jnp.float32) + bk_ref[...]
    vt = jnp.dot(fl, wv_ref[...], preferred_element_type=jnp.float32) + bv_ref[...]

    # --- Split heads into a batch-leading layout; cast to the operand dtype so
    #     every attention matmul hits the MXU at native (bf16 if input is bf16)
    #     width, with f32 accumulation via preferred_element_type.
    def to_heads(t):                      # (S, D) f32 -> (H, S, Dh) dt
        t = t.reshape(t.shape[0], num_heads, head_dim)
        return jnp.transpose(t, (1, 0, 2)).astype(dt)

    scale = 1.0 / math.sqrt(head_dim)
    qh  = to_heads(q * scale)             # stage-1 scale folded into q (f32 mul)
    kh  = to_heads(k)
    vh  = to_heads(v)
    kth = to_heads(kt)
    vth = to_heads(vt)

    # --- Stage 1: attend over the text (fl) sequence (all heads batched,
    #     contraction over the last axis of both operands -> no explicit .T).
    s1 = jnp.einsum("hqd,hkd->hqk", qh, kth,
                    preferred_element_type=jnp.float32)                     # (H, Sq, Sf)
    p1 = _softmax_last(s1).astype(dt)
    v_t = jnp.einsum("hqk,hkd->hqd", p1, vth,
                     preferred_element_type=jnp.float32)                    # (H, Sq, Dh) f32

    # --- Stage 2: attend back over the hidden_states sequence.
    #     Stage-2 1/sqrt(Dh) folded into v_t while still f32, then cast.
    v_t = (v_t * scale).astype(dt)
    s2 = jnp.einsum("hqd,hkd->hqk", v_t, kh,
                    preferred_element_type=jnp.float32)                     # (H, Sq, Sq)
    p2 = _softmax_last(s2).astype(dt)
    ctx = jnp.einsum("hqk,hkd->hqd", p2, vh,
                     preferred_element_type=jnp.float32)                    # (H, Sq, Dh)

    # --- Output projection without a head-merge transpose:
    #     wo (D, D) -> (H, Dh, D) is a cheap sublane split; per-head batched
    #     matmul then sum over the leading head axis (pure VALU adds), which is
    #     algebraically identical to merge-heads + (Sq, D) @ (D, D).
    wo3 = wo_ref[...].reshape(num_heads, head_dim, d)                       # (H, Dh, D)
    out_h = jnp.einsum("hqd,hdk->hqk", ctx.astype(dt), wo3,
                       preferred_element_type=jnp.float32)                  # (H, Sq, D)
    out = jnp.sum(out_h, axis=0) + bo_ref[...]
    o_ref[0] = out.astype(o_ref.dtype)


def _vmem_bytes_estimate(Sq, Sf, D, H, act_itemsize, w_itemsize):
    """Rough per-grid-step VMEM footprint (bytes) for the kernel above."""
    dh = D // H
    inputs   = 2 * (Sq + Sf) * D * act_itemsize         # double-buffered hs/fl blocks
    outputs  = 2 * Sq * D * act_itemsize                # double-buffered output block
    weights  = 2 * 4 * (D * D + D) * w_itemsize         # 4 weights+biases, 2 buffers each
    proj_f32 = (3 * Sq + 2 * Sf) * D * 4                # q,k,v,kt,vt f32 accumulators
    heads_dt = (3 * Sq + 2 * Sf) * D * act_itemsize     # head-split operand copies
    scores   = H * Sq * (Sf + Sq) * (4 + act_itemsize)  # f32 scores + dt probs
    ctx      = H * Sq * dh * (4 + act_itemsize) + H * Sq * D * 4 + Sq * D * 4
    return inputs + outputs + weights + proj_f32 + heads_dt + scores + ctx


def attention_forward(hs, fl, params, num_heads):
    B, Sq, D = hs.shape
    _, Sf, _ = fl.shape
    assert D % num_heads == 0
    head_dim = D // num_heads

    kernel = functools.partial(attention_kernel,
                               num_heads=num_heads, head_dim=head_dim)

    w_spec = pl.BlockSpec((D, D), lambda b: (0, 0))
    b_spec = pl.BlockSpec((1, D), lambda b: (0, 0))

    # Advisory cost hint so XLA schedules surrounding ops / overlap correctly.
    isz = hs.dtype.itemsize
    wsz = params["wq"].dtype.itemsize
    flops = 2 * B * (Sq * D * D                  # q projection
                     + 2 * (Sq + Sf) * D * D     # k and v projections (hs + fl)
                     + Sq * D * D                # out projection
                     + 2 * Sq * Sf * D           # stage-1 scores + pv
                     + 2 * Sq * Sq * D)          # stage-2 scores + pv
    transcendentals = B * num_heads * Sq * (Sf + Sq)
    bytes_accessed = (B * (2 * Sq + Sf) * D * isz + 4 * (D * D + D) * wsz)
    cost = pl.CostEstimate(flops=flops, transcendentals=transcendentals,
                           bytes_accessed=bytes_accessed)

    # Explicit scoped-VMEM budget: 2x headroom over the estimated footprint,
    # floored at 16 MiB (all-chip-safe default) and capped at 64 MiB (v7x
    # physical).  Larger shapes need the flash/Q-tile rewrite (see TODO).
    est = _vmem_bytes_estimate(Sq, Sf, D, num_heads, isz, wsz)
    vmem_limit = int(min(max(2 * est, 16 * 2**20), 64 * 2**20))

    return pl.pallas_call(
        kernel,
        out_shape=jax.ShapeDtypeStruct((B, Sq, D), hs.dtype),
        grid_spec=pltpu.PrefetchScalarGridSpec(
            num_scalar_prefetch=0,
            grid=(B,),
            in_specs=[
                pl.BlockSpec((1, Sq, D), lambda b: (b, 0, 0)),   # hidden_states
                pl.BlockSpec((1, Sf, D), lambda b: (b, 0, 0)),   # fl (text features)
                w_spec, b_spec,                                  # query
                w_spec, b_spec,                                  # key
                w_spec, b_spec,                                  # value
                w_spec, b_spec,                                  # out
            ],
            out_specs=pl.BlockSpec((1, Sq, D), lambda b: (b, 0, 0)),
        ),
        compiler_params=pltpu.CompilerParams(
            dimension_semantics=("parallel",),
            vmem_limit_bytes=vmem_limit),
        cost_estimate=cost,
    )(hs, fl,
      params["wq"], params["bq"], params["wk"], params["bk"],
      params["wv"], params["bv"], params["wo"], params["bo"])


def attention_reference(hs, fl, params, num_heads):
    """Pure-JAX reference mirroring the PyTorch forward (eval mode)."""
    B, Sq, D = hs.shape
    Dh = D // num_heads
    scale = 1.0 / math.sqrt(Dh)

    def proj(x, w, b):
        return x @ w + b

    def heads(x):  # (B, S, D) -> (B, H, S, Dh)
        B_, S_, _ = x.shape
        return x.reshape(B_, S_, num_heads, Dh).transpose(0, 2, 1, 3)

    q = heads(proj(hs, params["wq"], params["bq"]))
    k = heads(proj(hs, params["wk"], params["bk"]))
    v = heads(proj(hs, params["wv"], params["bv"]))
    kt = heads(proj(fl, params["wk"], params["bk"]))
    vt = heads(proj(fl, params["wv"], params["bv"]))

    s1 = jnp.einsum("bhqd,bhkd->bhqk", q, kt) * scale
    p1 = jax.nn.softmax(s1, axis=-1)
    v_t = jnp.einsum("bhqk,bhkd->bhqd", p1, vt)

    s2 = jnp.einsum("bhqd,bhkd->bhqk", v_t, k) * scale
    p2 = jax.nn.softmax(s2, axis=-1)
    ctx = jnp.einsum("bhqk,bhkd->bhqd", p2, v)

    ctx = ctx.transpose(0, 2, 1, 3).reshape(B, Sq, D)
    return ctx @ params["wo"] + params["bo"]


if __name__ == "__main__":
    # Small config: hidden_dim=32, fuse_num_heads=4 -> head_dim=8
    B, Sq, Sf, D, H = 2, 8, 8, 32, 4

    key = jax.random.PRNGKey(0)
    keys = jax.random.split(key, 10)
    scale = 0.1
    params = {
        "wq": scale * jax.random.normal(keys[0], (D, D), jnp.float32),
        "bq": scale * jax.random.normal(keys[1], (1, D), jnp.float32),
        "wk": scale * jax.random.normal(keys[2], (D, D), jnp.float32),
        "bk": scale * jax.random.normal(keys[3], (1, D), jnp.float32),
        "wv": scale * jax.random.normal(keys[4], (D, D), jnp.float32),
        "bv": scale * jax.random.normal(keys[5], (1, D), jnp.float32),
        "wo": scale * jax.random.normal(keys[6], (D, D), jnp.float32),
        "bo": scale * jax.random.normal(keys[7], (1, D), jnp.float32),
    }
    hidden_states = jax.random.normal(keys[8], (B, Sq, D), jnp.float32)
    fl = jax.random.normal(keys[9], (B, Sf, D), jnp.float32)

    out = attention_forward(hidden_states, fl, params, H)
    out = jax.block_until_ready(out)

    ref = attention_reference(hidden_states, fl, params, H)
    assert out.shape == (B, Sq, D)
    assert jnp.allclose(out, ref, atol=1e-2, rtol=1e-2), "mismatch vs reference"

    print("KERNEL_OK")
</pallas_src>

<mosaic_0001>
module attributes {stable_mosaic.version = 11 : i64} {
  func.func @attention_kernel(%arg0: i32, %arg1: memref<1x8x32xf32, #tpu.memory_space<vmem>>, %arg2: memref<1x8x32xf32, #tpu.memory_space<vmem>>, %arg3: memref<32x32xf32, #tpu.memory_space<vmem>>, %arg4: memref<1x32xf32, #tpu.memory_space<vmem>>, %arg5: memref<32x32xf32, #tpu.memory_space<vmem>>, %arg6: memref<1x32xf32, #tpu.memory_space<vmem>>, %arg7: memref<32x32xf32, #tpu.memory_space<vmem>>, %arg8: memref<1x32xf32, #tpu.memory_space<vmem>>, %arg9: memref<32x32xf32, #tpu.memory_space<vmem>>, %arg10: memref<1x32xf32, #tpu.memory_space<vmem>>, %arg11: memref<1x8x32xf32, #tpu.memory_space<vmem>>) attributes {dimension_semantics = [#tpu.dimension_semantics<parallel>], iteration_bounds = array<i64: 2>, scalar_prefetch = 0 : i64, scratch_operands = 0 : i64, tpu.core_type = #tpu.core_type<tc>, window_params = [{transform_indices = @transform_0, window_bounds = array<i64: 1, 8, 32>}, {transform_indices = @transform_1, window_bounds = array<i64: 1, 8, 32>}, {pipeline_mode = #tpu.pipeline_mode<synchronous>, transform_indices = @transform_2, window_bounds = array<i64: 32, 32>}, {pipeline_mode = #tpu.pipeline_mode<synchronous>, transform_indices = @transform_3, window_bounds = array<i64: 1, 32>}, {pipeline_mode = #tpu.pipeline_mode<synchronous>, transform_indices = @transform_4, window_bounds = array<i64: 32, 32>}, {pipeline_mode = #tpu.pipeline_mode<synchronous>, transform_indices = @transform_5, window_bounds = array<i64: 1, 32>}, {pipeline_mode = #tpu.pipeline_mode<synchronous>, transform_indices = @transform_6, window_bounds = array<i64: 32, 32>}, {pipeline_mode = #tpu.pipeline_mode<synchronous>, transform_indices = @transform_7, window_bounds = array<i64: 1, 32>}, {pipeline_mode = #tpu.pipeline_mode<synchronous>, transform_indices = @transform_8, window_bounds = array<i64: 32, 32>}, {pipeline_mode = #tpu.pipeline_mode<synchronous>, transform_indices = @transform_9, window_bounds = array<i64: 1, 32>}, {transform_indices = @transform_10, window_bounds = array<i64: 1, 8, 32>}]} {
    %c0 = arith.constant 0 : index
    %c0_0 = arith.constant 0 : index
    %c0_1 = arith.constant 0 : index
    %0 = vector.load %arg1[%c0, %c0_0, %c0_1] : memref<1x8x32xf32, #tpu.memory_space<vmem>>, vector<1x8x32xf32>
    %1 = vector.shape_cast %0 : vector<1x8x32xf32> to vector<8x32xf32>
    %c0_2 = arith.constant 0 : index
    %c0_3 = arith.constant 0 : index
    %c0_4 = arith.constant 0 : index
    %2 = vector.load %arg2[%c0_2, %c0_3, %c0_4] : memref<1x8x32xf32, #tpu.memory_space<vmem>>, vector<1x8x32xf32>
    %3 = vector.shape_cast %2 : vector<1x8x32xf32> to vector<8x32xf32>
    %c0_5 = arith.constant 0 : index
    %c0_6 = arith.constant 0 : index
    %4 = vector.load %arg3[%c0_5, %c0_6] : memref<32x32xf32, #tpu.memory_space<vmem>>, vector<32x32xf32>
    %cst = arith.constant dense<0.000000e+00> : vector<8x32xf32>
    %5 = tpu.matmul %1, %4, %cst {dimension_numbers = #tpu.dot_dimension_numbers<[1], [0], [0], [1], [0, 0, 1, 1], [], []>} : vector<8x32xf32>, vector<32x32xf32>, vector<8x32xf32> -> vector<8x32xf32>
    %c0_7 = arith.constant 0 : index
    %c0_8 = arith.constant 0 : index
    %6 = vector.load %arg4[%c0_7, %c0_8] : memref<1x32xf32, #tpu.memory_space<vmem>>, vector<1x32xf32>
    %7 = vector.broadcast %6 : vector<1x32xf32> to vector<8x32xf32>
    %8 = arith.addf %5, %7 : vector<8x32xf32>
    %c0_9 = arith.constant 0 : index
    %c0_10 = arith.constant 0 : index
    %9 = vector.load %arg5[%c0_9, %c0_10] : memref<32x32xf32, #tpu.memory_space<vmem>>, vector<32x32xf32>
    %cst_11 = arith.constant dense<0.000000e+00> : vector<8x32xf32>
    %10 = tpu.matmul %1, %9, %cst_11 {dimension_numbers = #tpu.dot_dimension_numbers<[1], [0], [0], [1], [0, 0, 1, 1], [], []>} : vector<8x32xf32>, vector<32x32xf32>, vector<8x32xf32> -> vector<8x32xf32>
    %c0_12 = arith.constant 0 : index
    %c0_13 = arith.constant 0 : index
    %11 = vector.load %arg6[%c0_12, %c0_13] : memref<1x32xf32, #tpu.memory_space<vmem>>, vector<1x32xf32>
    %12 = vector.broadcast %11 : vector<1x32xf32> to vector<8x32xf32>
    %13 = arith.addf %10, %12 : vector<8x32xf32>
    %c0_14 = arith.constant 0 : index
    %c0_15 = arith.constant 0 : index
    %14 = vector.load %arg7[%c0_14, %c0_15] : memref<32x32xf32, #tpu.memory_space<vmem>>, vector<32x32xf32>
    %cst_16 = arith.constant dense<0.000000e+00> : vector<8x32xf32>
    %15 = tpu.matmul %1, %14, %cst_16 {dimension_numbers = #tpu.dot_dimension_numbers<[1], [0], [0], [1], [0, 0, 1, 1], [], []>} : vector<8x32xf32>, vector<32x32xf32>, vector<8x32xf32> -> vector<8x32xf32>
    %c0_17 = arith.constant 0 : index
    %c0_18 = arith.constant 0 : index
    %16 = vector.load %arg8[%c0_17, %c0_18] : memref<1x32xf32, #tpu.memory_space<vmem>>, vector<1x32xf32>
    %17 = vector.broadcast %16 : vector<1x32xf32> to vector<8x32xf32>
    %18 = arith.addf %15, %17 : vector<8x32xf32>
    %c0_19 = arith.constant 0 : index
    %c0_20 = arith.constant 0 : index
    %19 = vector.load %arg5[%c0_19, %c0_20] : memref<32x32xf32, #tpu.memory_space<vmem>>, vector<32x32xf32>
    %cst_21 = arith.constant dense<0.000000e+00> : vector<8x32xf32>
    %20 = tpu.matmul %3, %19, %cst_21 {dimension_numbers = #tpu.dot_dimension_numbers<[1], [0], [0], [1], [0, 0, 1, 1], [], []>} : vector<8x32xf32>, vector<32x32xf32>, vector<8x32xf32> -> vector<8x32xf32>
    %c0_22 = arith.constant 0 : index
    %c0_23 = arith.constant 0 : index
    %21 = vector.load %arg6[%c0_22, %c0_23] : memref<1x32xf32, #tpu.memory_space<vmem>>, vector<1x32xf32>
    %22 = vector.broadcast %21 : vector<1x32xf32> to vector<8x32xf32>
    %23 = arith.addf %20, %22 : vector<8x32xf32>
    %c0_24 = arith.constant 0 : index
    %c0_25 = arith.constant 0 : index
    %24 = vector.load %arg7[%c0_24, %c0_25] : memref<32x32xf32, #tpu.memory_space<vmem>>, vector<32x32xf32>
    %cst_26 = arith.constant dense<0.000000e+00> : vector<8x32xf32>
    %25 = tpu.matmul %3, %24, %cst_26 {dimension_numbers = #tpu.dot_dimension_numbers<[1], [0], [0], [1], [0, 0, 1, 1], [], []>} : vector<8x32xf32>, vector<32x32xf32>, vector<8x32xf32> -> vector<8x32xf32>
    %c0_27 = arith.constant 0 : index
    %c0_28 = arith.constant 0 : index
    %26 = vector.load %arg8[%c0_27, %c0_28] : memref<1x32xf32, #tpu.memory_space<vmem>>, vector<1x32xf32>
    %27 = vector.broadcast %26 : vector<1x32xf32> to vector<8x32xf32>
    %28 = arith.addf %25, %27 : vector<8x32xf32>
    %cst_29 = arith.constant 0.353553385 : f32
    %29 = vector.broadcast %cst_29 : f32 to vector<8x32xf32>
    %30 = arith.mulf %8, %29 : vector<8x32xf32>
    %31 = vector.shape_cast %30 : vector<8x32xf32> to vector<8x4x8xf32>
    %32 = tpu.transpose %31, [1, 0, 2] : vector<8x4x8xf32> -> vector<4x8x8xf32>
    %33 = vector.shape_cast %13 : vector<8x32xf32> to vector<8x4x8xf32>
    %34 = tpu.transpose %33, [1, 0, 2] : vector<8x4x8xf32> -> vector<4x8x8xf32>
    %35 = vector.shape_cast %18 : vector<8x32xf32> to vector<8x4x8xf32>
    %36 = tpu.transpose %35, [1, 0, 2] : vector<8x4x8xf32> -> vector<4x8x8xf32>
    %37 = vector.shape_cast %23 : vector<8x32xf32> to vector<8x4x8xf32>
    %38 = tpu.transpose %37, [1, 0, 2] : vector<8x4x8xf32> -> vector<4x8x8xf32>
    %39 = vector.shape_cast %28 : vector<8x32xf32> to vector<8x4x8xf32>
    %40 = tpu.transpose %39, [1, 0, 2] : vector<8x4x8xf32> -> vector<4x8x8xf32>
    "tpu.trace_start"() <{level = 10 : i32, message = "hqd,hkd->hqk"}> : () -> ()
    %cst_30 = arith.constant dense<0.000000e+00> : vector<4x8x8xf32>
    %41 = tpu.matmul %32, %38, %cst_30 {dimension_numbers = #tpu.dot_dimension_numbers<[2], [2], [1], [1], [0, 0, 0, 1, 1, 1], [0], [0]>} : vector<4x8x8xf32>, vector<4x8x8xf32>, vector<4x8x8xf32> -> vector<4x8x8xf32>
    "tpu.trace_stop"() : () -> ()
    %cst_31 = arith.constant dense<0xFF800000> : vector<4x8xf32>
    %42 = vector.multi_reduction <maximumf>, %41, %cst_31 [2] : vector<4x8x8xf32> to vector<4x8xf32>
    %43 = vector.shape_cast %42 : vector<4x8xf32> to vector<4x8x1xf32>
    %44 = vector.broadcast %43 : vector<4x8x1xf32> to vector<4x8x8xf32>
    %45 = arith.subf %41, %44 : vector<4x8x8xf32>
    %46 = math.exp %45 : vector<4x8x8xf32>
    %cst_32 = arith.constant dense<0.000000e+00> : vector<4x8xf32>
    %47 = vector.multi_reduction <add>, %46, %cst_32 [2] : vector<4x8x8xf32> to vector<4x8xf32>
    %48 = vector.shape_cast %47 : vector<4x8xf32> to vector<4x8x1xf32>
    %49 = tpu.reciprocal %48 {approx = true} : vector<4x8x1xf32> -> vector<4x8x1xf32>
    %50 = vector.broadcast %49 : vector<4x8x1xf32> to vector<4x8x8xf32>
    %51 = arith.mulf %46, %50 : vector<4x8x8xf32>
    "tpu.trace_start"() <{level = 10 : i32, message = "hqk,hkd->hqd"}> : () -> ()
    %cst_33 = arith.constant dense<0.000000e+00> : vector<4x8x8xf32>
    %52 = tpu.matmul %51, %40, %cst_33 {dimension_numbers = #tpu.dot_dimension_numbers<[2], [1], [1], [2], [0, 0, 0, 1, 1, 2], [0], [0]>} : vector<4x8x8xf32>, vector<4x8x8xf32>, vector<4x8x8xf32> -> vector<4x8x8xf32>
    "tpu.trace_stop"() : () -> ()
    %cst_34 = arith.constant 0.353553385 : f32
    %53 = vector.broadcast %cst_34 : f32 to vector<4x8x8xf32>
    %54 = arith.mulf %52, %53 : vector<4x8x8xf32>
    "tpu.trace_start"() <{level = 10 : i32, message = "hqd,hkd->hqk"}> : () -> ()
    %cst_35 = arith.constant dense<0.000000e+00> : vector<4x8x8xf32>
    %55 = tpu.matmul %54, %34, %cst_35 {dimension_numbers = #tpu.dot_dimension_numbers<[2], [2], [1], [1], [0, 0, 0, 1, 1, 1], [0], [0]>} : vector<4x8x8xf32>, vector<4x8x8xf32>, vector<4x8x8xf32> -> vector<4x8x8xf32>
    "tpu.trace_stop"() : () -> ()
    %cst_36 = arith.constant dense<0xFF800000> : vector<4x8xf32>
    %56 = vector.multi_reduction <maximumf>, %55, %cst_36 [2] : vector<4x8x8xf32> to vector<4x8xf32>
    %57 = vector.shape_cast %56 : vector<4x8xf32> to vector<4x8x1xf32>
    %58 = vector.broadcast %57 : vector<4x8x1xf32> to vector<4x8x8xf32>
    %59 = arith.subf %55, %58 : vector<4x8x8xf32>
    %60 = math.exp %59 : vector<4x8x8xf32>
    %cst_37 = arith.constant dense<0.000000e+00> : vector<4x8xf32>
    %61 = vector.multi_reduction <add>, %60, %cst_37 [2] : vector<4x8x8xf32> to vector<4x8xf32>
    %62 = vector.shape_cast %61 : vector<4x8xf32> to vector<4x8x1xf32>
    %63 = tpu.reciprocal %62 {approx = true} : vector<4x8x1xf32> -> vector<4x8x1xf32>
    %64 = vector.broadcast %63 : vector<4x8x1xf32> to vector<4x8x8xf32>
    %65 = arith.mulf %60, %64 : vector<4x8x8xf32>
    "tpu.trace_start"() <{level = 10 : i32, message = "hqk,hkd->hqd"}> : () -> ()
    %cst_38 = arith.constant dense<0.000000e+00> : vector<4x8x8xf32>
    %66 = tpu.matmul %65, %36, %cst_38 {dimension_numbers = #tpu.dot_dimension_numbers<[2], [1], [1], [2], [0, 0, 0, 1, 1, 2], [0], [0]>} : vector<4x8x8xf32>, vector<4x8x8xf32>, vector<4x8x8xf32> -> vector<4x8x8xf32>
    "tpu.trace_stop"() : () -> ()
    %c0_39 = arith.constant 0 : index
    %c0_40 = arith.constant 0 : index
    %67 = vector.load %arg9[%c0_39, %c0_40] : memref<32x32xf32, #tpu.memory_space<vmem>>, vector<32x32xf32>
    %68 = vector.shape_cast %67 : vector<32x32xf32> to vector<4x8x32xf32>
    "tpu.trace_start"() <{level = 10 : i32, message = "hqd,hdk->hqk"}> : () -> ()
    %cst_41 = arith.constant dense<0.000000e+00> : vector<4x8x32xf32>
    %69 = tpu.matmul %66, %68, %cst_41 {dimension_numbers = #tpu.dot_dimension_numbers<[2], [1], [1], [2], [0, 0, 0, 1, 1, 2], [0], [0]>} : vector<4x8x8xf32>, vector<4x8x32xf32>, vector<4x8x32xf32> -> vector<4x8x32xf32>
    "tpu.trace_stop"() : () -> ()
    %cst_42 = arith.constant dense<0.000000e+00> : vector<8x32xf32>
    %70 = vector.multi_reduction <add>, %69, %cst_42 [0] : vector<4x8x32xf32> to vector<8x32xf32>
    %c0_43 = arith.constant 0 : index
    %c0_44 = arith.constant 0 : index
    %71 = vector.load %arg10[%c0_43, %c0_44] : memref<1x32xf32, #tpu.memory_space<vmem>>, vector<1x32xf32>
    %72 = vector.broadcast %71 : vector<1x32xf32> to vector<8x32xf32>
    %73 = arith.addf %70, %72 : vector<8x32xf32>
    %c0_45 = arith.constant 0 : index
    %c0_46 = arith.constant 0 : index
    %c0_47 = arith.constant 0 : index
    %74 = vector.load %arg11[%c0_45, %c0_46, %c0_47] : memref<1x8x32xf32, #tpu.memory_space<vmem>>, vector<1x8x32xf32>
    %75 = vector.shape_cast %74 : vector<1x8x32xf32> to vector<8x32xf32>
    %76 = vector.shape_cast %73 : vector<8x32xf32> to vector<1x8x32xf32>
    tpu.vector_store %arg11[%c0_45, %c0_46, %c0_47], %76 {strides = array<i32>} : memref<1x8x32xf32, #tpu.memory_space<vmem>>, vector<1x8x32xf32>,
    return
  }
  func.func @transform_0(%arg0: i32) -> (i32, i32, i32) {
    %c0_i32 = arith.constant 0 : i32
    %c0_i32_0 = arith.constant 0 : i32
    %c0_i32_1 = arith.constant 0 : i32
    return %arg0, %c0_i32, %c0_i32_0 : i32, i32, i32
  }
  func.func @transform_1(%arg0: i32) -> (i32, i32, i32) {
    %c0_i32 = arith.constant 0 : i32
    %c0_i32_0 = arith.constant 0 : i32
    %c0_i32_1 = arith.constant 0 : i32
    return %arg0, %c0_i32, %c0_i32_0 : i32, i32, i32
  }
  func.func @transform_2(%arg0: i32) -> (i32, i32) {
    %c0_i32 = arith.constant 0 : i32
    %c0_i32_0 = arith.constant 0 : i32
    %c0_i32_1 = arith.constant 0 : i32
    return %c0_i32, %c0_i32_0 : i32, i32
  }
  func.func @transform_3(%arg0: i32) -> (i32, i32) {
    %c0_i32 = arith.constant 0 : i32
    %c0_i32_0 = arith.constant 0 : i32
    %c0_i32_1 = arith.constant 0 : i32
    return %c0_i32, %c0_i32_0 : i32, i32
  }
  func.func @transform_4(%arg0: i32) -> (i32, i32) {
    %c0_i32 = arith.constant 0 : i32
    %c0_i32_0 = arith.constant 0 : i32
    %c0_i32_1 = arith.constant 0 : i32
    return %c0_i32, %c0_i32_0 : i32, i32
  }
  func.func @transform_5(%arg0: i32) -> (i32, i32) {
    %c0_i32 = arith.constant 0 : i32
    %c0_i32_0 = arith.constant 0 : i32
    %c0_i32_1 = arith.constant 0 : i32
    return %c0_i32, %c0_i32_0 : i32, i32
  }
  func.func @transform_6(%arg0: i32) -> (i32, i32) {
    %c0_i32 = arith.constant 0 : i32
    %c0_i32_0 = arith.constant 0 : i32
    %c0_i32_1 = arith.constant 0 : i32
    return %c0_i32, %c0_i32_0 : i32, i32
  }
  func.func @transform_7(%arg0: i32) -> (i32, i32) {
    %c0_i32 = arith.constant 0 : i32
    %c0_i32_0 = arith.constant 0 : i32
    %c0_i32_1 = arith.constant 0 : i32
    return %c0_i32, %c0_i32_0 : i32, i32
  }
  func.func @transform_8(%arg0: i32) -> (i32, i32) {
    %c0_i32 = arith.constant 0 : i32
    %c0_i32_0 = arith.constant 0 : i32
    %c0_i32_1 = arith.constant 0 : i32
    return %c0_i32, %c0_i32_0 : i32, i32
  }
  func.func @transform_9(%arg0: i32) -> (i32, i32) {
    %c0_i32 = arith.constant 0 : i32
    %c0_i32_0 = arith.constant 0 : i32
    %c0_i32_1 = arith.constant 0 : i32
    return %c0_i32, %c0_i32_0 : i32, i32
  }
  func.func @transform_10(%arg0: i32) -> (i32, i32, i32) {
    %c0_i32 = arith.constant 0 : i32
    %c0_i32_0 = arith.constant 0 : i32
    %c0_i32_1 = arith.constant 0 : i32
    return %arg0, %c0_i32, %c0_i32_0 : i32, i32, i32
  }
}

</mosaic_0001>

<bundles_post_ra>
// kernel: tpu_custom_call.1
= control target key start
LH: loop header
LB: loop body
LE: loop exit
PB: predicated region body
PF: predicated region fallthrough
CT: control target
= control target key end

     0   :  { %s4745_s0 = inlined_call_operand.hbm [shape: f32[2,8,32], index: 0, kind: input, shape index: {}]   ;;  %s4746_s1 = inlined_call_operand.hbm [shape: f32[2,8,32], index: 1, kind: input, shape index: {}]   ;;  %s4747_s2 = inlined_call_operand.hbm [shape: f32[32,32], index: 2, kind: input, shape index: {}]   ;;  %s4748_s3 = inlined_call_operand.vmem [shape: f32[1,32], index: 3, kind: input, shape index: {}]   ;;  %s4749_s4 = inlined_call_operand.hbm [shape: f32[32,32], index: 4, kind: input, shape index: {}]   ;;  %s4750_s5 = inlined_call_operand.vmem [shape: f32[1,32], index: 5, kind: input, shape index: {}]   ;;  %s4751_s6 = inlined_call_operand.hbm [shape: f32[32,32], index: 6, kind: input, shape index: {}]   ;;  %s4752_s7 = inlined_call_operand.vmem [shape: f32[1,32], index: 7, kind: input, shape index: {}]   ;;  %s4753_s8 = inlined_call_operand.hbm [shape: f32[32,32], index: 8, kind: input, shape index: {}]   ;;  %s4754_s9 = inlined_call_operand.vmem [shape: f32[1,32], index: 9, kind: input, shape index: {}]   ;;  %s4755_s10 = inlined_call_operand.hbm [shape: f32[2,8,32], index: 10, kind: output, shape index: {}]  }
   0x1   :  { %4761 = sst [smem:[#allocation21_spill]] %s4747_s2 }
   0x2   :  { %4762 = sst [smem:[#allocation22_spill]] %s4749_s4 }
   0x3   :  { %4763 = sst [smem:[#allocation23_spill]] %s4751_s6 }
   0x4   :  { %4764 = sst [smem:[#allocation24_spill]] %s4753_s8 }
   0x5   :  { %4765 = sst [smem:[#allocation25_spill]] %s4754_s9 }
   0x6   :  { %4766 = sst [smem:[#allocation26_spill]] %s4755_s10 }
   0x7   :  { %15 = vsyncpa [#allocation3], 0 }
   0x8   :  { %17 = vsyncpa [#allocation3 + $0x1], 0 }
   0x9   :  { %18 = vsyncpa [#allocation6], 0 }
   0xa   :  { %20 = vsyncpa [#allocation6 + $0x1], 0 }
   0xb   :  { %21 = vsyncpa [#allocation9], 0 }
   0xc   :  { %22 = vsyncpa [#allocation12], 0 }
   0xd   :  { %23 = vsyncpa [#allocation4], 0 }
   0xe   :  { %25 = vsyncpa [#allocation4 + $0x1], 0  ;;  %s4117_s13 = smov 0   ;;  %s4119_s14 = smov 0  }
   0xf   :  { %s4121_s15 = smov 0   ;;  %s4123_s16 = smov 0  }
  0x10 LB: > { %s4045_s17 = smov [#allocation7]   ;;  %s4138_s19 = sadd.s32 4294967295, %s4043_s16   ;;  %s4043_s16 = sphi %s4123_s16, %s4798_s16   ;;  %s4039_s15 = sphi %s4121_s15, %s4797_s15   ;;  %s4035_s14 = sphi %s4119_s14, %s4796_s14   ;;  %s4031_s13 = sphi %s4117_s13, %s4795_s13  }
  0x11   : > { %s294_s18 = sshll.u32 %s4045_s17, 4  ;;  %p3336_p0 = scmp.ge.s32.totalorder %s4043_s16, 1  ;;  %s4143_s18 = int_to_ptr.vmem [resolvable:$true] %s294_s18 }
  0x12   : > { %p4757_p1 = scmp.eq.s32.totalorder %s4138_s19, 0  ;;  %p282_p2 = scmp.lt.s32.totalorder %s4043_s16, 3 }
  0x13   : > { %s4046_s21 = smov [#allocation8]   ;;  %s4047_s24 = smov [#allocation10]  }
  0x14   : > { %p4145_p3 = pnand %p3336_p0, %p282_p2  ;;  %s310_s22 = sshll.u32 %s4046_s21, 4  ;;  %s4158_s22 = int_to_ptr.vmem [resolvable:$true] %s310_s22 }
  0x15   : > { %s326_s25 = sshll.u32 %s4047_s24, 4  ;;  %s4769_s2 = sld [smem:[#allocation21_spill]]  ;;  %s4160_s25 = int_to_ptr.vmem [resolvable:$true] %s326_s25 }
  0x16   : > { %s4767_s20 = scalar_select %p4145_p3, 1, 0 }
  0x17   : > { %p3677_p5 = pneg %p4145_p3 }
  0x19   : > { %p4154_p6 = pnand %p3677_p5, %p4757_p1 }
  0x1b   : > { %s3789_s28 = scalar_lea.hbm %s4769_s2, 512  ;;  %p4170_p8 = pneg %p4154_p6 }
  0x1c   : > { %p3790_p7 = scmp.ne.s32.totalorder %s4769_s2, %s3789_s28  ;;  %p3796_p11 = scmp.lt.u32.totalorder %s3789_s28, %s4769_s2 }
  0x1e   : > { %p3792_p9 = pnand %p4170_p8, %p3790_p7 }
  0x20   : > { %p3793_p10 = pneg %p3792_p9 }
  0x22   : > { %p3798_p12 = pnand %p3796_p11, %p3793_p10 }
  0x24   : > { %3801 = shalt.err (!%p3798_p12)
}
  0x25   : > { %s3802_s21 = scalar_lea.vmem %s4143_s18, 512  ;;  %p3810_p5 = scmp.lt.s32.totalorder %s4143_s18, %s4143_s18 }
  0x26   : > { %p3803_p13 = scmp.ne.s32.totalorder %s4143_s18, %s3802_s21  ;;  %p3811_p4 = scmp.lt.s32.totalorder %s3802_s21, %s3802_s21 }
  0x28   : > { %p3805_p0 = pnand %p3803_p13, %p4170_p8  ;;  %p3812_p7 = por %p3811_p4, %p3810_p5 }
  0x2a   : > { %p3806_p2 = pneg %p3805_p0 }
  0x2c   : > { %p3813_p9 = pnand %p3812_p7, %p3806_p2 }
  0x2e   : > { %3816 = shalt.err (!%p3813_p9)
}
  0x2f   : > { %s4048_s24 = smov 128   ;;  %s4049_s26 = smov 8  }
  0x30   : > { %3680 = dma.hbm_to_vmem [thread:$0]  (!%p4154_p6), %s4769_s2, 512, %s4143_s18, [#allocation6], %s4048_s24, %s4048_s24, %s4049_s26  }
  0x31   : > { %s4771_s4 = sld [smem:[#allocation22_spill]] }
  0x37   : > { %s3817_s12 = scalar_lea.hbm %s4771_s4, 512 }
  0x38   : > { %p3818_p4 = scmp.ne.s32.totalorder %s4771_s4, %s3817_s12  ;;  %p3824_p12 = scmp.lt.u32.totalorder %s3817_s12, %s4771_s4 }
  0x3a   : > { %p3820_p10 = pnand %p3818_p4, %p4170_p8 }
  0x3c   : > { %p3821_p11 = pneg %p3820_p10 }
  0x3e   : > { %p3826_p13 = pnand %p3824_p12, %p3821_p11 }
  0x40   : > { %3829 = shalt.err (!%p3826_p13)
}
  0x41   : > { %s3830_s18 = scalar_lea.vmem %s4158_s22, 512  ;;  %p3838_p7 = scmp.lt.s32.totalorder %s4158_s22, %s4158_s22 }
  0x42   : > { %p3831_p0 = scmp.ne.s32.totalorder %s4158_s22, %s3830_s18  ;;  %p3839_p9 = scmp.lt.s32.totalorder %s3830_s18, %s3830_s18 }
  0x44   : > { %p3833_p2 = pnand %p3831_p0, %p4170_p8  ;;  %p3840_p4 = por %p3839_p9, %p3838_p7 }
  0x46   : > { %p3834_p5 = pneg %p3833_p2 }
  0x48   : > { %p3841_p10 = pnand %p3840_p4, %p3834_p5 }
  0x4a   : > { %3844 = shalt.err (!%p3841_p10)
}
  0x4b   : > { %3683 = dma.hbm_to_vmem [thread:$0]  (!%p4154_p6), %s4771_s4, 512, %s4158_s22, [#allocation9], %s4048_s24, %s4048_s24, %s4049_s26  }
  0x4c   : > { %s4772_s6 = sld [smem:[#allocation23_spill]] }
  0x52   : > { %s3845_s29 = scalar_lea.hbm %s4772_s6, 512 }
  0x53   : > { %p3846_p11 = scmp.ne.s32.totalorder %s4772_s6, %s3845_s29  ;;  %p3852_p0 = scmp.lt.u32.totalorder %s3845_s29, %s4772_s6 }
  0x55   : > { %p3848_p12 = pnand %p3846_p11, %p4170_p8 }
  0x57   : > { %p3849_p13 = pneg %p3848_p12 }
  0x59   : > { %p3854_p2 = pnand %p3852_p0, %p3849_p13 }
  0x5b   : > { %3857 = shalt.err (!%p3854_p2)
}
  0x5c   : > { %s3858_s22 = scalar_lea.vmem %s4160_s25, 512  ;;  %p3866_p4 = scmp.lt.s32.totalorder %s4160_s25, %s4160_s25 }
  0x5d   : > { %p3859_p5 = scmp.ne.s32.totalorder %s4160_s25, %s3858_s22  ;;  %p3867_p10 = scmp.lt.s32.totalorder %s3858_s22, %s3858_s22 }
  0x5f   : > { %p3861_p7 = pnand %p3859_p5, %p4170_p8  ;;  %p3868_p11 = por %p3867_p10, %p3866_p4 }
  0x61   : > { %p3862_p9 = pneg %p3861_p7 }
  0x63   : > { %p3869_p12 = pnand %p3868_p11, %p3862_p9 }
  0x65   : > { %3872 = shalt.err (!%p3869_p12)
}
  0x66   : > { %3686 = dma.hbm_to_vmem [thread:$0]  (!%p4154_p6), %s4772_s6, 512, %s4160_s25, [#allocation9], %s4048_s24, %s4048_s24, %s4049_s26  }
  0x67   : > { %s4050_s10 = smov [#allocation11]   ;;  %s4773_s8 = sld [smem:[#allocation24_spill]] }
  0x68   : > { %s342_s27 = sshll.u32 %s4050_s10, 4  ;;  %s343_s27 = int_to_ptr.vmem [resolvable:$true] %s342_s27 }
  0x6d   : > { %s3873_s30 = scalar_lea.hbm %s4773_s8, 512 }
  0x6e   : > { %p3874_p13 = scmp.ne.s32.totalorder %s4773_s8, %s3873_s30  ;;  %p3880_p5 = scmp.lt.u32.totalorder %s3873_s30, %s4773_s8 }
  0x70   : > { %p3876_p0 = pnand %p3874_p13, %p4170_p8 }
  0x72   : > { %p3877_p2 = pneg %p3876_p0 }
  0x74   : > { %p3882_p7 = pnand %p3880_p5, %p3877_p2 }
  0x76   : > { %3885 = shalt.err (!%p3882_p7)
}
  0x77   : > { %s3886_s25 = scalar_lea.vmem %s343_s27, 512  ;;  %p3894_p11 = scmp.lt.s32.totalorder %s343_s27, %s343_s27 }
  0x78   : > { %p3887_p9 = scmp.ne.s32.totalorder %s343_s27, %s3886_s25  ;;  %p3895_p12 = scmp.lt.s32.totalorder %s3886_s25, %s3886_s25 }
  0x7a   : > { %p3889_p4 = pnand %p3887_p9, %p4170_p8  ;;  %p3896_p1 = por %p3895_p12, %p3894_p11 }
  0x7c   : > { %p3890_p10 = pneg %p3889_p4 }
  0x7e   : > { %p3897_p3 = pnand %p3896_p1, %p3890_p10 }
  0x80   : > { %3900 = shalt.err (!%p3897_p3)
}
  0x81   : > { %3689 = dma.hbm_to_vmem [thread:$0]  (!%p4154_p6), %s4773_s8, 512, %s343_s27, [#allocation12], %s4048_s24, %s4048_s24, %s4049_s26  }
  0x82   : > { %s3335_s23 = sadd.s32 4294967294, %s4043_s16   ;;  %s4269_s11 = sadd.s32 1, %s4043_s16  }
  0x83   : > { %s35_s10 = ssub.s32 %s4043_s16, %s4269_s11  ;;  %s38_s28 = sadd.s32 1, %s4039_s15 }
  0x84   : > { %p36_p1 = scmp.eq.s32.totalorder %s35_s10, 0  ;;  %p45_p3 = scmp.ne.s32.totalorder %s4039_s15, %s4035_s14 }
  0x85   : > { %p46_p8 = scmp.eq.s32.totalorder %s4043_s16, 0  ;;  %p51_p13 = scmp.ne.s32.totalorder %s4035_s14, %s4031_s13 }
  0x86   : > { %s4280_s29 = scalar_select %p36_p1, %s4039_s15, %s38_s28  }
  0x87   : > { %p4282_p0 = por %p46_p8, %p45_p3  ;;  %p4776_p2 = scmp.eq.s32.totalorder %s4138_s19, 0 }
  0x88   : > { %4774 = sst [smem:[#allocation20_spill]] %s4280_s29  ;;  %p269_p5 = scmp.eq.s32.totalorder %s4138_s19, 1 }
  0x89   : > { %p4288_p6 = por %p4776_p2, %p51_p13  ;;  %p275_p7 = scmp.eq.s32.totalorder %s3335_s23, 1 }
  0x8a   : > { %p3705_p9 = scmp.lt.s32.totalorder %s4043_s16, 2  ;;  %s359_s26 = sand.u32 1, %s4039_s15  }
  0x8b   : > { %s4777_s24 = scalar_select %p4288_p6, 1, 0 }
  0x8c   : > { %p4295_p4 = por %p269_p5, %p45_p3  ;;  %p4299_p10 = por %p275_p7, %p51_p13 }
  0x8d   : > { %s4303_s17 = sshll.u32 %s359_s26, 3  ;;  %s3343_s21 = sshll.u32 %s4043_s16, 7 }
  0x8e   : > { %s4778_s27 = scalar_select %p4295_p4, 1, 0 }
  0x8f   : > { %s4779_s12 = scalar_select %p4299_p10, 1, 0 }
  0x90   : > { %s4309_s18 = scalar_lea.hbm %s4745_s0, %s3343_s21  ;;  %s363_s9 = scalar_lea.vmem [#allocation2], %s4303_s17 }
  0x91   : > { %s370_s23 = sshll.u32 %s363_s9, 4  ;;  %p4316_p11 = pnand %p3705_p9, %p4282_p0  ;;  %s4312_s23 = int_to_ptr.vmem [resolvable:$true] %s370_s23 }
  0x92   : > { %s4323_s22 = scalar_lea.hbm %s4746_s1, %s3343_s21  ;;  %s377_s25 = sand.u32 1, %s4043_s16  }
  0x93   : > { %s360_s4 = scalar_lea.sflag [#allocation3], %s359_s26  ;;  %s3901_s6 = scalar_lea.hbm %s4309_s18, 128 }
  0x94   : > { %p3902_p12 = scmp.ne.s32.totalorder %s4309_s18, %s3901_s6  ;;  %p3903_p1 = pneg %p4316_p11 }
  0x95   : > { %s3906_s8 = scalar_lea.hbm %s4745_s0, 256  ;;  %p3907_p13 = scmp.lt.u32.totalorder %s4309_s18, %s4745_s0 }
  0x96   : > { %p3904_p3 = pnand %p3903_p1, %p3902_p12  ;;  %p3908_p0 = scmp.lt.u32.totalorder %s3906_s8, %s3901_s6 }
  0x97   : > { %p3910_p5 = scmp.lt.u32.totalorder %s3901_s6, %s4309_s18 }
  0x98   : > { %p3905_p8 = pneg %p3904_p3  ;;  %p3909_p2 = por %p3908_p0, %p3907_p13 }
  0x9a   : > { %p3911_p7 = por %p3910_p5, %p3909_p2 }
  0x9c   : > { %p3912_p9 = pnand %p3911_p7, %p3905_p8 }
  0x9e   : > { %3915 = shalt.err (!%p3912_p9)
}
  0x9f   : > { %s3916_s26 = scalar_lea.vmem %s4312_s23, 128  ;;  %s4051_s21 = smov [#allocation2]  }
  0xa0   : > { %p3917_p12 = scmp.ne.s32.totalorder %s4312_s23, %s3916_s26  ;;  %s3921_s28 = sshll.u32 %s4051_s21, 4  ;;  %s3922_s28 = int_to_ptr.vmem [resolvable:$false] %s3921_s28 }
  0xa1   : > { %s3923_s29 = scalar_lea.vmem %s3922_s28, 256  ;;  %p3924_p4 = scmp.lt.s32.totalorder %s4312_s23, %s3922_s28 }
  0xa2   : > { %p3919_p3 = pnand %p3917_p12, %p3903_p1  ;;  %p3925_p13 = scmp.lt.s32.totalorder %s3923_s29, %s3916_s26 }
  0xa4   : > { %p3920_p10 = pneg %p3919_p3  ;;  %p3926_p0 = por %p3925_p13, %p3924_p4 }
  0xa6   : > { %p3927_p2 = pnand %p3926_p0, %p3920_p10 }
  0xa8   : > { %3930 = shalt.err (!%p3927_p2)
}
  0xa9   : > { %3693 = dma.hbm_to_vmem [thread:$0]  (!%p4316_p11), %s4309_s18, 128, %s4312_s23, %s360_s4  }
  0xaa   : > { %s381_s6 = scalar_lea.vmem [#allocation5], %s4303_s17  ;;  %s378_s30 = scalar_lea.sflag [#allocation6], %s377_s25 }
  0xab   : > { %s388_s8 = sshll.u32 %s381_s6, 4  ;;  %s3931_s9 = scalar_lea.hbm %s4323_s22, 128  ;;  %s389_s8 = int_to_ptr.vmem [resolvable:$true] %s388_s8 }
  0xac   : > { %p3932_p4 = scmp.ne.s32.totalorder %s4323_s22, %s3931_s9  ;;  %s3936_s21 = scalar_lea.hbm %s4746_s1, 256 }
  0xad   : > { %p3937_p5 = scmp.lt.u32.totalorder %s4323_s22, %s4746_s1  ;;  %p3938_p7 = scmp.lt.u32.totalorder %s3936_s21, %s3931_s9 }
  0xae   : > { %p3934_p10 = pnand %p3932_p4, %p3903_p1  ;;  %p3940_p12 = scmp.lt.u32.totalorder %s3931_s9, %s4323_s22 }
  0xaf   : > { %p3939_p9 = por %p3938_p7, %p3937_p5 }
  0xb0   : > { %p3935_p8 = pneg %p3934_p10 }
  0xb1   : > { %p3941_p3 = por %p3940_p12, %p3939_p9 }
  0xb3   : > { %p3942_p13 = pnand %p3941_p3, %p3935_p8 }
  0xb5   : > { %3945 = shalt.err (!%p3942_p13)
}
  0xb6   : > { %s3946_s4 = scalar_lea.vmem %s389_s8, 128  ;;  %s4052_s17 = smov [#allocation5]  }
  0xb7   : > { %p3947_p0 = scmp.ne.s32.totalorder %s389_s8, %s3946_s4  ;;  %s3951_s18 = sshll.u32 %s4052_s17, 4  ;;  %s3952_s18 = int_to_ptr.vmem [resolvable:$false] %s3951_s18 }
  0xb8   : > { %s3953_s23 = scalar_lea.vmem %s3952_s18, 256  ;;  %p3954_p10 = scmp.lt.s32.totalorder %s389_s8, %s3952_s18 }
  0xb9   : > { %p3949_p2 = pnand %p3947_p0, %p3903_p1  ;;  %p3955_p6 = scmp.lt.s32.totalorder %s3953_s23, %s3946_s4 }
  0xbb   : > { %p3950_p4 = pneg %p3949_p2  ;;  %p3956_p5 = por %p3955_p6, %p3954_p10 }
  0xbd   : > { %p3957_p7 = pnand %p3956_p5, %p3950_p4 }
  0xbf   : > { %3960 = shalt.err (!%p3957_p7)
}
  0xc0   : > { %3696 = dma.hbm_to_vmem [thread:$0]  (!%p4316_p11), %s4323_s22, 128, %s389_s8, %s378_s30  }
  0xc1   : > { %p4781_p8 = scmp.ne.s32.totalorder %s4767_s20, 0 }
  0xc2   : > { %s4376_s25 = sand.u32 (!%p4781_p8), 1, %s4035_s14   ;;  %p4782_p6 = scmp.ne.s32.totalorder (!%p4781_p8), %s4777_s24, 0 }
  0xc3   : > { %397 = sbr.rel (%p4781_p8) target bundleno = 2342 (0x926), region = 60  ;;  %s4379_s6 = sshll.u32 (!%p4781_p8), %s4376_s25, 3 }
  0xc4   : > { %s400_s9 = scalar_lea.sflag (!%p4781_p8), [#allocation3], %s4376_s25  ;;  %s403_s2 = scalar_lea.vmem (!%p4781_p8), [#allocation2], %s4379_s6 }
  0xca   : > { %4006 = dma.done.wait (%p4782_p6), %s400_s9, 128  }
  0xcb   : > { %4008 = vsyncadd (%p4782_p6), %s400_s9, 4294967168  ;;  %s408_s20 = sand.u32 1, %s4138_s19   ;;  %s412_s22 = scalar_lea.vmem [#allocation5], %s4379_s6 }
  0xcc   : > { %s409_s10 = scalar_lea.sflag [#allocation6], %s408_s20 }
  0xcd   : > { %4010 = dma.done.wait (%p4782_p6), %s409_s10, 128  }
  0xce   : > { %4012 = vsyncadd (%p4782_p6), %s409_s10, 4294967168  ;;  %p4783_p11 = scmp.eq.s32.totalorder %s4138_s19, 0 }
  0xd0   : > { %4014 = dma.done.wait (%p4783_p11), [#allocation6], 512   ;;  %p4784_p1 = pmov %p4783_p11 }
  0xd2   : > { %4016 = vsyncadd (%p4784_p1), [#allocation6], 4294966784  ;;  %p4785_p9 = pmov %p4784_p1 }
  0xd3   : > { %p4786_p12 = pmov %p4784_p1 }
  0xd4   : > { %4018 = dma.done.wait (%p4785_p9), [#allocation9], 1024  }
  0xd5   : > { %4020 = vsyncadd (%p4786_p12), [#allocation9], 4294966272  ;;  %p4787_p3 = pmov %p4784_p1 }
  0xd6   : > { %p4788_p13 = pmov %p4784_p1 }
  0xd7   : > { %4022 = dma.done.wait (%p4787_p3), [#allocation12], 512  }
  0xd8   : > { %4024 = vsyncadd (%p4788_p13), [#allocation12], 4294966784  ;;  %v4053_v0 = vmov 0.0|0.0   ;;  %vm4054_vm0 = vmmov 0   ;;  %v4055_v1 = vmov 0.0   ;;  %v557_v2 = vld [vmem:[#allocation8] sm:$0xff]  ;;  %v878_v37 = vlaneseq }
  0xd9   : > { %3631 = vmatprep.subr.bf16.mxu1 %v4053_v0  ;;  %3625 = vmatprep.subr.bf16.mxu0 %v4053_v0  ;;  %v558_v3 = vld [vmem:[#allocation8 + $0x8] sm:$0xff]  ;;  %v472_v4 = vld [vmem:[#allocation7] sm:$0xff]  ;;  %v559_v7 = vld [vmem:[#allocation8 + $0x10] sm:$0xff]  ;;  %vm483_vm1 = vcmask 261120   ;;  %s4056_s21 = smov 120   ;;  %s4057_s28 = smov 104  }
  0xda   : > { %3489 = vmatprep.mubr.msk.f32.mxu1 %vm4054_vm0, %v4055_v1  ;;  %3478 = vmatprep.mubr.msk.f32.mxu0 %vm4054_vm0, %v4055_v1  ;;  %v3632_v5 = vpack.c.bf16 %v558_v3, %v557_v2  ;;  %v473_v6 = vld [vmem:[#allocation7 + $0x8] sm:$0xff]  ;;  %v560_v8 = vld [vmem:[#allocation8 + $0x18] sm:$0xff]  ;;  %v474_v10 = vld [vmem:[#allocation7 + $0x10] sm:$0xff]  ;;  %s4058_s29 = smov 112   ;;  %v4059_v35 = vmov 1983009808  }
  0xdb   : > { %v3626_v9 = vpack.c.bf16 %v473_v6, %v472_v4  ;;  %v475_v11 = vld [vmem:[#allocation7 + $0x18] sm:$0xff]  ;;  %v3635_v12 = vpack.c.bf16 %v560_v8, %v559_v7  ;;  %v470_v14 = vld [vmem:[%s403_s2] sm:$0xff]  ;;  %v640_v22 = vld [vmem:[#allocation10 + $0x10] sm:$0xff]  ;;  %v876_v36 = vunpack.c.l.s4 %v4059_v35  ;;  %v4060_v38 = vmov 1934713408   ;;  %s4789_s9 = sld [smem:[#allocation25_spill]] }
  0xdc   : > { %3633 = vmatpush3.bf16.msra.mxu1 %v3632_v5  ;;  %v3629_v13 = vpack.c.bf16 %v475_v11, %v474_v10  ;;  %v471_v15 = vld [vmem:[%s412_s22] sm:$0xff]  ;;  %v638_v16 = vld [vmem:[#allocation10] sm:$0xff]  ;;  %v639_v17 = vld [vmem:[#allocation10 + $0x8] sm:$0xff]  ;;  %v908_v39 = vunpack.c.l.s4 %v4060_v38  ;;  %v879_v41 = vshrl.u32 %v878_v37, 7  ;;  %vm1593_vm2 = vcmask 64512   ;;  %s3402_s2 = sshll.u32 %s4138_s19, 7 }
  0xdd   : > { %3627 = vmatpush3.bf16.msra.mxu0 %v3626_v9  ;;  %3634 = vmatprep.subr.bf16.mxu1 %v4053_v0  ;;  %v3638_v18 = vpack.c.bf16 %v639_v17, %v638_v16  ;;  %v3356_v19 = vld [vmem:[%s4750_s5] ss:$0 sm:$0xff]  ;;  %v641_v23 = vld [vmem:[#allocation10 + $0x18] sm:$0xff]  ;;  %v877_v40 = vunpack.c.0.s8 %v876_v36  ;;  %s469_s20 = scalar_lea.vmem [#allocation13], %s4379_s6  ;;  %s4790_s8 = sld [smem:[#allocation26_spill]] }
  0xde   : > { %3628 = vmatprep.subr.bf16.mxu0 %v4053_v0  ;;  %v3354_v20 = vld [vmem:[%s4748_s3] ss:$0 sm:$0xff]  ;;  %v3641_v27 = vpack.c.bf16 %v641_v23, %v640_v22  ;;  %v909_v44 = vunpack.c.0.s8 %v908_v39  ;;  %s3204_s10 = sshll.u32 %s469_s20, 4  ;;  %s3191_s26 = scalar_lea.sflag [#allocation4], %s4376_s25  ;;  %s4702_s10 = int_to_ptr.vmem [resolvable:$true] %s3204_s10 }
  0xdf   : > { %v4454_v45 = vsub.s32 %v877_v40, %v879_v41  ;;  %p4791_p2 = scmp.ne.s32.totalorder %s4778_s27, 0  ;;  %s4061_s19 = smov [#allocation13]  }
  0xe0   : > { %3636 = vmatpush3.bf16.msra.mxu1 %v3635_v12  ;;  %v4456_v52 = vsub.s32 %v909_v44, %v879_v41  ;;  %s3965_s6 = sshll.u32 %s4061_s19, 4  ;;  %s3966_s6 = int_to_ptr.vmem [resolvable:$false] %s3965_s6 }
  0xe1   : > { %3630 = vmatpush3.bf16.msra.mxu0 %v3629_v13  ;;  %3643 = vmatprep.subr.bf16.mxu1 %v4053_v0  ;;  %p3968_p5 = scmp.lt.s32.totalorder %s4702_s10, %s3966_s6 }
  0xe2   : > { %3637 = vmatprep.subr.bf16.mxu0 %v4053_v0 }
  0xe3   : > { %3490 = vmatmul.mubr.msk.f32.vlgmr.msra.gmra.mrb[0].mxu1 %vm483_vm1, %v470_v14  ;;  %s4700_s30 = scalar_lea.hbm %s4790_s8, %s3402_s2 }
  0xe4   : > { %3645 = vmatpush3.bf16.msra.mxu1 %v3632_v5  ;;  %3479 = vmatmul.mubr.msk.f32.vlgmr.msra.gmra.mrb[0].mxu0 %vm483_vm1, %v470_v14 }
  0xe5   : > { %3646 = vmatprep.subr.bf16.mxu1 %v4053_v0  ;;  %3511 = vmatprep.mubr.msk.f32.mxu1 %vm4054_vm0, %v4055_v1 }
  0xe6   : > { %3500 = vmatprep.mubr.msk.f32.mxu0 %vm4054_vm0, %v4055_v1  ;;  %3639 = vmatpush3.bf16.msra.mxu0 %v3638_v18 }
  0xe7   : > { %3640 = vmatprep.subr.bf16.mxu0 %v4053_v0 }
  0xe8   : > { %3648 = vmatpush3.bf16.msra.mxu1 %v3635_v12 }
  0xe9   : > { %3525 = vmatprep.subr.mxu1 %v4055_v1 }
  0xea   : > { %3642 = vmatpush3.bf16.msra.mxu0 %v3641_v27 }
  0xeb   : > { %3512 = vmatmul.mubr.msk.f32.vlgmr.msra.gmra.mrb[2].mxu1 %vm483_vm1, %v471_v15  ;;  %3649 = vmatprep.subr.bf16.mxu0 %v4053_v0 }
  0xec   : > { %3527 = vmatprep.mubr.msk.f32.mxu1 %vm4054_vm0, %v4055_v1 }
  0xed   : > { %3501 = vmatmul.mubr.msk.f32.vlgmr.msra.gmra.mrb[2].mxu0 %vm483_vm1, %v470_v14 }
  0xee   : > { %3651 = vmatpush3.bf16.msra.mxu0 %v3638_v18  ;;  %3522 = vmatprep.mubr.msk.f32.mxu0 %vm4054_vm0, %v4055_v1 }
  0xef   : > { %3652 = vmatprep.subr.bf16.mxu0 %v4053_v0 }
  0xf2   : > { %3654 = vmatpush3.bf16.msra.mxu0 %v3641_v27 }
  0xf3   : > { %3535 = vmatprep.subr.mxu0 %v4055_v1 }
  0xf5   : > { %3523 = vmatmul.mubr.msk.f32.vlgmr.msra.gmra.mrb[4].mxu0 %vm483_vm1, %v471_v15 }
  0xf6   : > { %3537 = vmatprep.mubr.msk.f32.mxu0 %vm4054_vm0, %v4055_v1 }
 0x1b6   : > { %v634_v21 = vpop.f32.mrb[0].mxu1 }
 0x1b7   : > { %v4437_v24 = vadd.f32 %v3356_v19, %v634_v21  ;;  %v3491_v25 = vpop.f32.mrb[1].mxu1  ;;  %v553_v26 = vpop.f32.mrb[0].mxu0 }
 0x1b8   : > { %v554_v28 = vadd.f32 %v3354_v20, %v553_v26  ;;  %v3480_v29 = vpop.f32.mrb[1].mxu0 }
 0x1ba   : > { %v862_v30 = vmul.f32 0.35355338, %v554_v28 }
 0x1bc   : > { %864 = vrot.lane.b32.xlu1 %v862_v30, %s4056_s21 }
 0x1be   : > { %v788_v31 = vpop.f32.mrb[2].mxu1 }
 0x1bf   : > { %v789_v32 = vadd.f32 %v3356_v19, %v788_v31  ;;  %v3513_v33 = vpop.f32.mrb[3].mxu1 }
 0x1c1   : > { %1302 = vrot.lane.b32.xlu0 %v789_v32, %s4056_s21  ;;  %1308 = vrot.lane.b32.xlu1 %v789_v32, %s4057_s28 }
 0x1c5   : > { %1305 = vrot.lane.b32.xlu0 %v789_v32, %s4058_s29  ;;  %870 = vrot.lane.b32.xlu1 %v862_v30, %s4057_s28 }
 0x1c9   : > { %867 = vrot.lane.b32.xlu0 %v862_v30, %s4058_s29 }
 0x22e   : > { %v865_v34 = vpop.permute.xlu1 %864 }
 0x233   : > { %v1303_v42 = vpop.permute.xlu0 %1302  ;;  %v1309_v43 = vpop.permute.xlu1 %1308 }
 0x234   : > { %v1327_v46 = vcombine.low %v1303_v42, %v1309_v43  ;;  %v1328_v47 = vcombine.high %v1303_v42, %v1309_v43 }
 0x236   : > { %v1335_v53 = vrot.slane %v1327_v46, %v4454_v45  ;;  %v1342_v54 = vrot.slane %v1328_v47, %v4454_v45 }
 0x237   : > { %v1306_v48 = vpop.permute.xlu0 %1305  ;;  %v871_v51 = vpop.permute.xlu1 %870 }
 0x238   : > { %v1311_v49 = vcombine.low %v789_v32, %v1306_v48  ;;  %v1312_v50 = vcombine.high %v789_v32, %v1306_v48  ;;  %v889_v57 = vcombine.low %v865_v34, %v871_v51  ;;  %v890_v58 = vcombine.high %v865_v34, %v871_v51 }
 0x23a   : > { %v1319_v55 = vrot.slane %v1311_v49, %v4454_v45  ;;  %v1326_v56 = vrot.slane %v1312_v50, %v4454_v45  ;;  %v897_v7 = vrot.slane %v889_v57, %v4454_v45  ;;  %v904_v8 = vrot.slane %v890_v58, %v4454_v45 }
 0x23b   : > { %v868_v59 = vpop.permute.xlu0 %867 }
 0x23c   : > { %v1343_v60 = vcombine.low %v1319_v55, %v1335_v53  ;;  %v1344_v61 = vcombine.high %v1319_v55, %v1335_v53  ;;  %v1359_v62 = vcombine.low %v1326_v56, %v1342_v54  ;;  %v1360_v63 = vcombine.high %v1326_v56, %v1342_v54 }
 0x23d   : > { %v873_v0 = vcombine.low %v862_v30, %v868_v59  ;;  %v874_v2 = vcombine.high %v862_v30, %v868_v59 }
 0x23e   : > { %v1351_v3 = vrot.slane %v1343_v60, %v4456_v52  ;;  %v1358_v4 = vrot.slane %v1344_v61, %v4456_v52  ;;  %v1367_v5 = vrot.slane %v1359_v62, %v4456_v52  ;;  %v1374_v6 = vrot.slane %v1360_v63, %v4456_v52  ;;  %v3358_v62 = vld [vmem:[%s4752_s7] ss:$0 sm:$0xff]  ;;  %v715_v63 = vpop.f32.mrb[2].mxu0 }
 0x23f   : > { %v881_v9 = vrot.slane %v873_v0, %v4454_v45  ;;  %v888_v10 = vrot.slane %v874_v2, %v4454_v45  ;;  %v4513_v0 = vadd.f32 %v3358_v62, %v715_v63  ;;  %v3502_v2 = vpop.f32.mrb[3].mxu0 }
 0x240   : > { %v1379_v11 = vcombine.low %v1351_v3, %v1358_v4  ;;  %v3368_v12 = vcombine.high %v1351_v3, %v1358_v4  ;;  %v1395_v13 = vcombine.low %v1367_v5, %v1374_v6  ;;  %v3369_v14 = vcombine.high %v1367_v5, %v1374_v6  ;;  %v858_v3 = vpop.f32.mrb[4].mxu0 }
 0x241   : > { %v905_v15 = vcombine.low %v881_v9, %v897_v7  ;;  %v906_v16 = vcombine.high %v881_v9, %v897_v7  ;;  %v921_v17 = vcombine.low %v888_v10, %v904_v8  ;;  %v922_v18 = vcombine.high %v888_v10, %v904_v8  ;;  %v3524_v4 = vpop.f32.mrb[5].mxu0 }
 0x242   : > { %v1386_v19 = vrot.slane %v1379_v11, %v4454_v45  ;;  %v1394_v20 = vrot.slane %v3368_v12, %v4454_v45  ;;  %v1402_v21 = vrot.slane %v1395_v13, %v4454_v45  ;;  %v1410_v22 = vrot.slane %v3369_v14, %v4454_v45 }
 0x243   : > { %v913_v23 = vrot.slane %v905_v15, %v4456_v52  ;;  %v920_v25 = vrot.slane %v906_v16, %v4456_v52  ;;  %v929_v26 = vrot.slane %v921_v17, %v4456_v52  ;;  %v936_v27 = vrot.slane %v922_v18, %v4456_v52 }
 0x244   : > { %v1411_v28 = vcombine.low %v1386_v19, %v1394_v20  ;;  %v1412_v29 = vcombine.high %v1386_v19, %v1394_v20  ;;  %v1427_v30 = vcombine.low %v1402_v21, %v1410_v22  ;;  %v1428_v31 = vcombine.high %v1402_v21, %v1410_v22 }
 0x245   : > { %v941_v32 = vcombine.low %v913_v23, %v920_v25  ;;  %v3362_v33 = vcombine.high %v913_v23, %v920_v25  ;;  %v957_v34 = vcombine.low %v929_v26, %v936_v27  ;;  %v3363_v35 = vcombine.high %v929_v26, %v936_v27 }
 0x246   : > { %v1419_v36 = vrot.slane %v1411_v28, %v4456_v52  ;;  %v1435_v37 = vrot.slane %v1427_v30, %v4456_v52  ;;  %v1426_v38 = vrot.slane %v1412_v29, %v4456_v52  ;;  %v1442_v39 = vrot.slane %v1428_v31, %v4456_v52 }
 0x247   : > { %v948_v40 = vrot.slane %v941_v32, %v4454_v45  ;;  %v956_v41 = vrot.slane %v3362_v33, %v4454_v45  ;;  %v964_v42 = vrot.slane %v957_v34, %v4454_v45  ;;  %v972_v43 = vrot.slane %v3363_v35, %v4454_v45 }
 0x248   : > { %v1443_v44 = vcombine.low %v1419_v36, %v1435_v37  ;;  %v1445_v46 = vcombine.low %v1426_v38, %v1442_v39  ;;  %v1444_v58 = vcombine.high %v1419_v36, %v1435_v37  ;;  %v1446_v60 = vcombine.high %v1426_v38, %v1442_v39 }
 0x249   : > { %v973_v47 = vcombine.low %v948_v40, %v956_v41  ;;  %v974_v48 = vcombine.high %v948_v40, %v956_v41  ;;  %v989_v49 = vcombine.low %v964_v42, %v972_v43  ;;  %v990_v50 = vcombine.high %v964_v42, %v972_v43 }
 0x24a   : > { %3526 = vmatpush3.xpose.msk.msra.mxu1 %vm1593_vm2, %v1443_v44  ;;  %3536 = vmatpush3.xpose.msk.msra.mxu0 %vm1593_vm2, %v1445_v46  ;;  %v859_v17 = vadd.f32 %v3358_v62, %v858_v3 }
 0x24b   : > { %3530 = vmatprep.subr.mxu1 %v4055_v1  ;;  %v981_v51 = vrot.slane %v973_v47, %v4456_v52  ;;  %v997_v53 = vrot.slane %v989_v49, %v4456_v52  ;;  %v988_v54 = vrot.slane %v974_v48, %v4456_v52  ;;  %v1004_v55 = vrot.slane %v990_v50, %v4456_v52 }
 0x24c   : > { %3545 = vmatprep.subr.mxu0 %v4055_v1 }
 0x24d   : > { %v1005_v56 = vcombine.low %v981_v51, %v997_v53  ;;  %v1007_v57 = vcombine.low %v988_v54, %v1004_v55  ;;  %v1006_v59 = vcombine.high %v981_v51, %v997_v53  ;;  %v1008_v61 = vcombine.high %v988_v54, %v1004_v55 }
 0x24f   : > { %3528 = vmatmul.mubr.msk.f32.vlgmr.msra.gmra.mrb[4].mxu1 %vm1593_vm2, %v1005_v56  ;;  %3538 = vmatmul.mubr.msk.f32.vlgmr.msra.gmra.mrb[6].mxu0 %vm1593_vm2, %v1007_v57 }
 0x250   : > { %3531 = vmatpush3.xpose.msk.msra.mxu1 %vm1593_vm2, %v1444_v58  ;;  %3532 = vmatprep.mubr.msk.f32.mxu1 %vm4054_vm0, %v4055_v1 }
 0x251   : > { %3540 = vmatprep.subr.mxu1 %v4055_v1  ;;  %3547 = vmatprep.mubr.msk.f32.mxu0 %vm4054_vm0, %v4055_v1 }
 0x253   : > { %3533 = vmatmul.mubr.msk.f32.vlgmr.msra.gmra.mrb[6].mxu1 %vm1593_vm2, %v1006_v59 }
 0x254   : > { %3541 = vmatpush3.xpose.msk.msra.mxu1 %vm1593_vm2, %v1446_v60  ;;  %3542 = vmatprep.mubr.msk.f32.mxu1 %vm4054_vm0, %v4055_v1 }
 0x255   : > { %3550 = vmatprep.subr.mxu1 %v4055_v1 }
 0x257   : > { %3543 = vmatmul.mubr.msk.f32.vlgmr.msra.gmra.mrb[8].mxu1 %vm1593_vm2, %v1008_v61 }
 0x258   : > { %3552 = vmatprep.mubr.msk.f32.mxu1 %vm4054_vm0, %v4055_v1 }
 0x322   : > { %v1666_v5 = vpop.f32.mrb[4].mxu1  ;;  %v1818_v6 = vpop.f32.mrb[6].mxu0 }
 0x323   : > { %v3529_v7 = vpop.f32.mrb[5].mxu1  ;;  %v3539_v8 = vpop.f32.mrb[7].mxu0  ;;  %v1898_v9 = vsel %vm1593_vm2, %v1666_v5, -inf  ;;  %v1904_v13 = vsel %vm1593_vm2, %v1818_v6, -inf }
 0x324   : > { %1899 = vmax.xlane.f32.xlu0 %v1898_v9 }
 0x326   : > { %v1742_v10 = vpop.f32.mrb[6].mxu1 }
 0x327   : > { %v3534_v11 = vpop.f32.mrb[7].mxu1  ;;  %v1901_v12 = vsel %vm1593_vm2, %v1742_v10, -inf }
 0x328   : > { %1902 = vmax.xlane.f32.xlu1 %v1901_v12  ;;  %1905 = vmax.xlane.f32.xlu0 %v1904_v13 }
 0x32a   : > { %v1894_v14 = vpop.f32.mrb[8].mxu1 }
 0x32b   : > { %v3544_v15 = vpop.f32.mrb[9].mxu1  ;;  %v1907_v16 = vsel %vm1593_vm2, %v1894_v14, -inf }
 0x32c   : > { %1908 = vmax.xlane.f32.xlu0 %v1907_v16 }
 0x339   : > { %1448 = vrot.lane.b32.xlu1 %v859_v17, %s4056_s21 }
 0x3b1   : > { %v1900_v18 = vpop.xlane.xlu0 %1899 }
 0x3b2   : > { %v1910_v19 = vsub.f32 %v1666_v5, %v1900_v18 }
 0x3b4   : > { %v1914_v20 = vmul.f32 1.442695, %v1910_v19 }
 0x3b5   : > { %v1903_v21 = vpop.xlane.xlu1 %1902  ;;  %v1906_v22 = vpop.xlane.xlu0 %1905 }
 0x3b6   : > { %3757 = vpow2.f32 %v1914_v20  ;;  %v1911_v23 = vsub.f32 %v1742_v10, %v1903_v21  ;;  %v1912_v25 = vsub.f32 %v1818_v6, %v1906_v22 }
 0x3b8   : > { %v1916_v26 = vmul.f32 1.442695, %v1911_v23  ;;  %v1918_v27 = vmul.f32 1.442695, %v1912_v25 }
 0x3b9   : > { %v1909_v28 = vpop.xlane.xlu0 %1908  ;;  %v1449_v39 = vpop.permute.xlu1 %1448 }
 0x3ba   : > { %3759 = vpow2.f32 %v1916_v26  ;;  %v1913_v29 = vsub.f32 %v1894_v14, %v1909_v28 }
 0x3bb   : > { %3761 = vpow2.f32 %v1918_v27 }
 0x3bc   : > { %v1920_v30 = vmul.f32 1.442695, %v1913_v29 }
 0x3be   : > { %3763 = vpow2.f32 %v1920_v30 }
 0x3c0   : > { %v4520_v31 = vpop.eup %3757 }
 0x3c1   : > { %v1922_v32 = vsel %vm1593_vm2, %v4520_v31, 0.0 }
 0x3c2   : > { %1923 = vadd.xlane.f32.xlu1 %v1922_v32 }
 0x3c4   : > { %v4524_v33 = vpop.eup %3759 }
 0x3c5   : > { %v4526_v34 = vpop.eup %3761  ;;  %v1925_v35 = vsel %vm1593_vm2, %v4524_v33, 0.0 }
 0x3c6   : > { %1926 = vadd.xlane.f32.xlu0 %v1925_v35  ;;  %v1928_v36 = vsel %vm1593_vm2, %v4526_v34, 0.0 }
 0x3c7   : > { %1929 = vadd.xlane.f32.xlu1 %v1928_v36 }
 0x3c8   : > { %v4532_v37 = vpop.eup %3763 }
 0x3c9   : > { %v1931_v38 = vsel %vm1593_vm2, %v4532_v37, 0.0 }
 0x3ca   : > { %1932 = vadd.xlane.f32.xlu0 %v1931_v38 }
 0x3d8   : > { %1454 = vrot.lane.b32.xlu1 %v859_v17, %s4057_s28 }
 0x3dc   : > { %1010 = vrot.lane.b32.xlu1 %v4437_v24, %s4056_s21 }
 0x3e0   : > { %1016 = vrot.lane.b32.xlu1 %v4437_v24, %s4057_s28  ;;  %1451 = vrot.lane.b32.xlu0 %v859_v17, %s4058_s29 }
 0x3e4   : > { %1013 = vrot.lane.b32.xlu0 %v4437_v24, %s4058_s29 }
 0x44f   : > { %v1924_v40 = vpop.xlane.xlu1 %1923 }
 0x450   : > { %3765 = vrcp.f32 %v1924_v40 }
 0x453   : > { %v1927_v41 = vpop.xlane.xlu0 %1926 }
 0x454   : > { %v1930_v42 = vpop.xlane.xlu1 %1929  ;;  %3767 = vrcp.f32 %v1927_v41 }
 0x455   : > { %3769 = vrcp.f32 %v1930_v42 }
 0x457   : > { %v1933_v43 = vpop.xlane.xlu0 %1932 }
 0x458   : > { %v1455_v44 = vpop.permute.xlu1 %1454  ;;  %3771 = vrcp.f32 %v1933_v43 }
 0x459   : > { %v1473_v46 = vcombine.low %v1449_v39, %v1455_v44  ;;  %v1474_v47 = vcombine.high %v1449_v39, %v1455_v44 }
 0x45a   : > { %v3766_v29 = vpop.eup %3765 }
 0x45b   : > { %v1452_v48 = vpop.permute.xlu0 %1451  ;;  %v1481_v53 = vrot.slane %v1473_v46, %v4454_v45  ;;  %v1488_v54 = vrot.slane %v1474_v47, %v4454_v45 }
 0x45c   : > { %v1011_v49 = vpop.permute.xlu1 %1010  ;;  %v1457_v50 = vcombine.low %v859_v17, %v1452_v48  ;;  %v1458_v51 = vcombine.high %v859_v17, %v1452_v48 }
 0x45e   : > { %v1465_v55 = vrot.slane %v1457_v50, %v4454_v45  ;;  %v1472_v56 = vrot.slane %v1458_v51, %v4454_v45  ;;  %v3768_v38 = vpop.eup %3767 }
 0x45f   : > { %v1014_v57 = vpop.permute.xlu0 %1013  ;;  %v3770_v50 = vpop.eup %3769 }
 0x460   : > { %v1489_v58 = vcombine.low %v1465_v55, %v1481_v53  ;;  %v1490_v59 = vcombine.high %v1465_v55, %v1481_v53  ;;  %v1505_v60 = vcombine.low %v1472_v56, %v1488_v54  ;;  %v1017_v61 = vpop.permute.xlu1 %1016  ;;  %v1506_v62 = vcombine.high %v1472_v56, %v1488_v54 }
 0x461   : > { %v1035_v63 = vcombine.low %v1011_v49, %v1017_v61  ;;  %v1036_v2 = vcombine.high %v1011_v49, %v1017_v61  ;;  %v1019_v3 = vcombine.low %v4437_v24, %v1014_v57  ;;  %v1020_v7 = vcombine.high %v4437_v24, %v1014_v57 }
 0x462   : > { %v1497_v4 = vrot.slane %v1489_v58, %v4456_v52  ;;  %v1504_v5 = vrot.slane %v1490_v59, %v4456_v52  ;;  %v1513_v6 = vrot.slane %v1505_v60, %v4456_v52  ;;  %v1520_v8 = vrot.slane %v1506_v62, %v4456_v52  ;;  %v3772_v59 = vpop.eup %3771 }
 0x463   : > { %v1043_v9 = vrot.slane %v1035_v63, %v4454_v45  ;;  %v1050_v10 = vrot.slane %v1036_v2, %v4454_v45  ;;  %v1027_v13 = vrot.slane %v1019_v3, %v4454_v45  ;;  %v1034_v14 = vrot.slane %v1020_v7, %v4454_v45 }
 0x464   : > { %v1525_v11 = vcombine.low %v1497_v4, %v1504_v5  ;;  %v3370_v12 = vcombine.high %v1497_v4, %v1504_v5  ;;  %v1541_v15 = vcombine.low %v1513_v6, %v1520_v8  ;;  %v3371_v16 = vcombine.high %v1513_v6, %v1520_v8 }
 0x465   : > { %v1051_v18 = vcombine.low %v1027_v13, %v1043_v9  ;;  %v1052_v19 = vcombine.high %v1027_v13, %v1043_v9  ;;  %v1067_v22 = vcombine.low %v1034_v14, %v1050_v10  ;;  %v1068_v23 = vcombine.high %v1034_v14, %v1050_v10 }
 0x466   : > { %v1532_v17 = vrot.slane %v1525_v11, %v4454_v45  ;;  %v1540_v24 = vrot.slane %v3370_v12, %v4454_v45  ;;  %v1548_v20 = vrot.slane %v1541_v15, %v4454_v45  ;;  %v1556_v21 = vrot.slane %v3371_v16, %v4454_v45 }
 0x467   : > { %v1059_v25 = vrot.slane %v1051_v18, %v4456_v52  ;;  %v1066_v26 = vrot.slane %v1052_v19, %v4456_v52  ;;  %v1075_v30 = vrot.slane %v1067_v22, %v4456_v52  ;;  %v1082_v32 = vrot.slane %v1068_v23, %v4456_v52 }
 0x468   : > { %v1557_v27 = vcombine.low %v1532_v17, %v1540_v24  ;;  %v1558_v28 = vcombine.high %v1532_v17, %v1540_v24  ;;  %v1573_v35 = vcombine.low %v1548_v20, %v1556_v21  ;;  %v1574_v36 = vcombine.high %v1548_v20, %v1556_v21 }
 0x469   : > { %v1087_v39 = vcombine.low %v1059_v25, %v1066_v26  ;;  %v3364_v40 = vcombine.high %v1059_v25, %v1066_v26  ;;  %v1103_v42 = vcombine.low %v1075_v30, %v1082_v32  ;;  %v3365_v43 = vcombine.high %v1075_v30, %v1082_v32 }
 0x46a   : > { %v1565_v41 = vrot.slane %v1557_v27, %v4456_v52  ;;  %v1581_v44 = vrot.slane %v1573_v35, %v4456_v52  ;;  %v1572_v48 = vrot.slane %v1558_v28, %v4456_v52  ;;  %v1588_v49 = vrot.slane %v1574_v36, %v4456_v52 }
 0x46b   : > { %v1094_v46 = vrot.slane %v1087_v39, %v4454_v45  ;;  %v1102_v47 = vrot.slane %v3364_v40, %v4454_v45  ;;  %v1110_v51 = vrot.slane %v1103_v42, %v4454_v45  ;;  %v1118_v53 = vrot.slane %v3365_v43, %v4454_v45 }
 0x46c   : > { %v1589_v54 = vcombine.low %v1565_v41, %v1581_v44  ;;  %v1590_v55 = vcombine.high %v1565_v41, %v1581_v44  ;;  %v1938_v56 = vmul.f32 %v3766_v29, %v4520_v31  ;;  %v1939_v57 = vmul.f32 %v3768_v38, %v4524_v33 }
 0x46d   : > { %v1120_v58 = vcombine.high %v1094_v46, %v1102_v47  ;;  %v1119_v60 = vcombine.low %v1094_v46, %v1102_v47  ;;  %v1135_v61 = vcombine.low %v1110_v51, %v1118_v53  ;;  %v1136_v62 = vcombine.high %v1110_v51, %v1118_v53 }
 0x46e   : > { %3546 = vmatpush3.msra.mxu0 %v1589_v54  ;;  %3551 = vmatpush3.msra.mxu1 %v1590_v55  ;;  %v1591_v63 = vcombine.low %v1572_v48, %v1588_v49  ;;  %v1592_v2 = vcombine.high %v1572_v48, %v1588_v49  ;;  %v1940_v33 = vmul.f32 %v3770_v50, %v4526_v34 }
 0x46f   : > { %3548 = vmatmul.mubr.msk.f32.vlgmr.msra.gmra.mrb[8].mxu0 %vm1593_vm2, %v1938_v56  ;;  %3553 = vmatmul.mubr.msk.f32.vlgmr.msra.gmra.mrb[10].mxu1 %vm1593_vm2, %v1939_v57  ;;  %v1134_v3 = vrot.slane %v1120_v58, %v4456_v52  ;;  %v1150_v31 = vrot.slane %v1136_v62, %v4456_v52  ;;  %v1941_v4 = vmul.f32 %v3772_v59, %v4532_v37 }
 0x470   : > { %3555 = vmatprep.subr.mxu0 %v4055_v1  ;;  %3560 = vmatprep.subr.mxu1 %v4055_v1  ;;  %v1127_v5 = vrot.slane %v1119_v60, %v4456_v52  ;;  %v1143_v6 = vrot.slane %v1135_v61, %v4456_v52 }
 0x471   : > { %3556 = vmatpush3.msra.mxu0 %v1591_v63  ;;  %3561 = vmatpush3.msra.mxu1 %v1592_v2  ;;  %v1153_v7 = vcombine.low %v1134_v3, %v1150_v31  ;;  %v1154_v34 = vcombine.high %v1134_v3, %v1150_v31 }
 0x472   : > { %3557 = vmatprep.mubr.msk.f32.mxu0 %vm4054_vm0, %v4055_v1  ;;  %3562 = vmatprep.mubr.msk.f32.mxu1 %vm4054_vm0, %v4055_v1  ;;  %v1151_v37 = vcombine.low %v1127_v5, %v1143_v6  ;;  %v1152_v8 = vcombine.high %v1127_v5, %v1143_v6 }
 0x473   : > { %3558 = vmatmul.mubr.msk.f32.vlgmr.msra.gmra.mrb[10].mxu0 %vm1593_vm2, %v1940_v33  ;;  %3563 = vmatmul.mubr.msk.f32.vlgmr.msra.gmra.mrb[12].mxu1 %vm1593_vm2, %v1941_v4 }
 0x474   : > { %3565 = vmatprep.subr.mxu0 %v4055_v1  ;;  %3570 = vmatprep.subr.mxu1 %v4055_v1 }
 0x475   : > { %3567 = vmatprep.mubr.msk.f32.mxu0 %vm4054_vm0, %v4055_v1  ;;  %3572 = vmatprep.mubr.msk.f32.mxu1 %vm4054_vm0, %v4055_v1 }
 0x478   : > { %3566 = vmatpush3.xpose.msk.msra.mxu0 %vm1593_vm2, %v1151_v37  ;;  %3571 = vmatpush3.xpose.msk.msra.mxu1 %vm1593_vm2, %v1152_v8 }
 0x479   : > { %3575 = vmatprep.subr.mxu0 %v4055_v1  ;;  %3580 = vmatprep.subr.mxu1 %v4055_v1 }
 0x542   : > { %v2011_v9 = vpop.f32.mrb[8].mxu0  ;;  %v2084_v10 = vpop.f32.mrb[10].mxu1 }
 0x543   : > { %v2234_v11 = vmul.f32 0.35355338, %v2011_v9  ;;  %v2235_v12 = vmul.f32 0.35355338, %v2084_v10  ;;  %v3549_v13 = vpop.f32.mrb[9].mxu0  ;;  %v3554_v14 = vpop.f32.mrb[11].mxu1 }
 0x545   : > { %3568 = vmatmul.mubr.msk.f32.vlgmr.msra.gmra.mrb[12].mxu0 %vm1593_vm2, %v2234_v11  ;;  %3573 = vmatmul.mubr.msk.f32.vlgmr.msra.gmra.mrb[14].mxu1 %vm1593_vm2, %v2235_v12 }
 0x546   : > { %3576 = vmatpush3.xpose.msk.msra.mxu0 %vm1593_vm2, %v1153_v7  ;;  %3581 = vmatpush3.xpose.msk.msra.mxu1 %vm1593_vm2, %v1154_v34  ;;  %v2157_v15 = vpop.f32.mrb[10].mxu0  ;;  %v2230_v16 = vpop.f32.mrb[12].mxu1 }
 0x547   : > { %v2236_v17 = vmul.f32 0.35355338, %v2157_v15  ;;  %v2237_v24 = vmul.f32 0.35355338, %v2230_v16  ;;  %v3559_v18 = vpop.f32.mrb[11].mxu0  ;;  %v3564_v19 = vpop.f32.mrb[13].mxu1  ;;  %3577 = vmatprep.mubr.msk.f32.mxu0 %vm4054_vm0, %v4055_v1  ;;  %3582 = vmatprep.mubr.msk.f32.mxu1 %vm4054_vm0, %v4055_v1 }
 0x548   : > { %3585 = vmatprep.subr.mxu0 %v4055_v1  ;;  %3590 = vmatprep.subr.mxu1 %v4055_v1 }
 0x549   : > { %3578 = vmatmul.mubr.msk.f32.vlgmr.msra.gmra.mrb[14].mxu0 %vm1593_vm2, %v2236_v17  ;;  %3583 = vmatmul.mubr.msk.f32.vlgmr.msra.gmra.mrb[16].mxu1 %vm1593_vm2, %v2237_v24 }
 0x54a   : > { %3587 = vmatprep.mubr.msk.f32.mxu0 %vm4054_vm0, %v4055_v1  ;;  %3592 = vmatprep.mubr.msk.f32.mxu1 %vm4054_vm0, %v4055_v1 }
 0x618   : > { %v2310_v20 = vpop.f32.mrb[12].mxu0  ;;  %v2386_v21 = vpop.f32.mrb[14].mxu1 }
 0x619   : > { %v3569_v22 = vpop.f32.mrb[13].mxu0  ;;  %v3574_v23 = vpop.f32.mrb[15].mxu1  ;;  %v2545_v25 = vsel %vm1593_vm2, %v2386_v21, -inf  ;;  %v2542_v26 = vsel %vm1593_vm2, %v2310_v20, -inf }
 0x61a   : > { %2546 = vmax.xlane.f32.xlu1 %v2545_v25  ;;  %2543 = vmax.xlane.f32.xlu0 %v2542_v26 }
 0x61c   : > { %v2462_v27 = vpop.f32.mrb[14].mxu0  ;;  %v2538_v28 = vpop.f32.mrb[16].mxu1 }
 0x61d   : > { %v3579_v29 = vpop.f32.mrb[15].mxu0  ;;  %v3584_v30 = vpop.f32.mrb[17].mxu1  ;;  %v2548_v32 = vsel %vm1593_vm2, %v2462_v27, -inf  ;;  %v2551_v35 = vsel %vm1593_vm2, %v2538_v28, -inf }
 0x61e   : > { %2549 = vmax.xlane.f32.xlu0 %v2548_v32 }
 0x622   : > { %2552 = vmax.xlane.f32.xlu0 %v2551_v35 }
 0x62b   : > { %1156 = vrot.lane.b32.xlu1 %v4513_v0, %s4056_s21  ;;  %s3961_s21 = scalar_lea.vmem %s4702_s10, 128 }
 0x62c   : > { %p3962_p0 = scmp.ne.s32.totalorder %s4702_s10, %s3961_s21 }
 0x62e   : > { %p3963_p4 = pnand %p3962_p0, %p4791_p2 }
 0x630   : > { %p3964_p10 = pneg %p3963_p4 }
 0x6a7   : > { %v2547_v36 = vpop.xlane.xlu1 %2546  ;;  %v2544_v38 = vpop.xlane.xlu0 %2543 }
 0x6a8   : > { %v2555_v39 = vsub.f32 %v2386_v21, %v2547_v36  ;;  %v2554_v40 = vsub.f32 %v2310_v20, %v2544_v38 }
 0x6aa   : > { %v2560_v41 = vmul.f32 1.442695, %v2555_v39  ;;  %v2558_v42 = vmul.f32 1.442695, %v2554_v40 }
 0x6ab   : > { %v2550_v43 = vpop.xlane.xlu0 %2549  ;;  %v1157_v59 = vpop.permute.xlu1 %1156 }
 0x6ac   : > { %3773 = vpow2.f32 %v2560_v41  ;;  %v2556_v44 = vsub.f32 %v2462_v27, %v2550_v43 }
 0x6ad   : > { %3775 = vpow2.f32 %v2558_v42 }
 0x6ae   : > { %v2562_v46 = vmul.f32 1.442695, %v2556_v44 }
 0x6af   : > { %v2553_v47 = vpop.xlane.xlu0 %2552 }
 0x6b0   : > { %3777 = vpow2.f32 %v2562_v46  ;;  %v2557_v48 = vsub.f32 %v2538_v28, %v2553_v47  ;;  %v2878_v46 = vld [vmem:[#allocation11] sm:$0xff]  ;;  %v2879_v47 = vld [vmem:[#allocation11 + $0x8] sm:$0xff] }
 0x6b2   : > { %v2564_v49 = vmul.f32 1.442695, %v2557_v48  ;;  %v2880_v48 = vld [vmem:[#allocation11 + $0x10] sm:$0xff] }
 0x6b4   : > { %3779 = vpow2.f32 %v2564_v49 }
 0x6b6   : > { %v4624_v50 = vpop.eup %3773 }
 0x6b7   : > { %v3776_v51 = vpop.eup %3775  ;;  %v2569_v53 = vsel %vm1593_vm2, %v4624_v50, 0.0 }
 0x6b8   : > { %v2566_v54 = vsel %vm1593_vm2, %v3776_v51, 0.0  ;;  %2570 = vadd.xlane.f32.xlu0 %v2569_v53 }
 0x6b9   : > { %2567 = vadd.xlane.f32.xlu1 %v2566_v54 }
 0x6ba   : > { %v4629_v55 = vpop.eup %3777 }
 0x6bb   : > { %v2572_v56 = vsel %vm1593_vm2, %v4629_v55, 0.0 }
 0x6bd   : > { %2573 = vadd.xlane.f32.xlu1 %v2572_v56 }
 0x6be   : > { %v4633_v57 = vpop.eup %3779 }
 0x6bf   : > { %v2575_v58 = vsel %vm1593_vm2, %v4633_v57, 0.0 }
 0x6c0   : > { %2576 = vadd.xlane.f32.xlu0 %v2575_v58 }
 0x6ce   : > { %1162 = vrot.lane.b32.xlu1 %v4513_v0, %s4057_s28  ;;  %s3967_s28 = scalar_lea.vmem %s3966_s6, 256 }
 0x6cf   : > { %p3969_p7 = scmp.lt.s32.totalorder %s3967_s28, %s3961_s21 }
 0x6d1   : > { %p3970_p8 = por %p3969_p7, %p3968_p5 }
 0x6d3   : > { %p3971_p6 = pnand %p3970_p8, %p3964_p10 }
 0x6d6   : > { %1159 = vrot.lane.b32.xlu0 %v4513_v0, %s4058_s29 }
 0x745   : > { %v2571_v61 = vpop.xlane.xlu0 %2570 }
 0x746   : > { %v2568_v60 = vpop.xlane.xlu1 %2567  ;;  %3781 = vrcp.f32 %v2571_v61 }
 0x747   : > { %3783 = vrcp.f32 %v2568_v60 }
 0x74a   : > { %v2574_v62 = vpop.xlane.xlu1 %2573 }
 0x74b   : > { %3785 = vrcp.f32 %v2574_v62 }
 0x74d   : > { %v2577_v63 = vpop.xlane.xlu0 %2576 }
 0x74e   : > { %v1163_v2 = vpop.permute.xlu1 %1162  ;;  %3787 = vrcp.f32 %v2577_v63 }
 0x74f   : > { %v1181_v3 = vcombine.low %v1157_v59, %v1163_v2  ;;  %v1182_v31 = vcombine.high %v1157_v59, %v1163_v2 }
 0x750   : > { %v3782_v27 = vpop.eup %3781 }
 0x751   : > { %v1160_v33 = vpop.permute.xlu0 %1159  ;;  %v1189_v6 = vrot.slane %v1181_v3, %v4454_v45  ;;  %v1196_v7 = vrot.slane %v1182_v31, %v4454_v45  ;;  %v3784_v29 = vpop.eup %3783 }
 0x752   : > { %v1165_v4 = vcombine.low %v4513_v0, %v1160_v33  ;;  %v1166_v5 = vcombine.high %v4513_v0, %v1160_v33  ;;  %v2582_v40 = vmul.f32 %v3784_v29, %v3776_v51  ;;  %v2881_v51 = vld [vmem:[#allocation11 + $0x18] sm:$0xff] }
 0x754   : > { %v1173_v34 = vrot.slane %v1165_v4, %v4454_v45  ;;  %v1180_v37 = vrot.slane %v1166_v5, %v4454_v45 }
 0x755   : > { %v3786_v39 = vpop.eup %3785 }
 0x756   : > { %v1197_v8 = vcombine.low %v1173_v34, %v1189_v6  ;;  %v1198_v9 = vcombine.high %v1173_v34, %v1189_v6  ;;  %v1213_v10 = vcombine.low %v1180_v37, %v1196_v7  ;;  %v1214_v11 = vcombine.high %v1180_v37, %v1196_v7  ;;  %v3400_v34 = vld [vmem:[%s4789_s9] ss:$0 sm:$0xff] }
 0x758   : > { %v1205_v12 = vrot.slane %v1197_v8, %v4456_v52  ;;  %v1212_v13 = vrot.slane %v1198_v9, %v4456_v52  ;;  %v1221_v0 = vrot.slane %v1213_v10, %v4456_v52  ;;  %v1228_v14 = vrot.slane %v1214_v11, %v4456_v52  ;;  %v3788_v41 = vpop.eup %3787 }
 0x759   : > { %v2585_v44 = vmul.f32 %v3788_v41, %v4633_v57 }
 0x75a   : > { %v1233_v15 = vcombine.low %v1205_v12, %v1212_v13  ;;  %v3366_v16 = vcombine.high %v1205_v12, %v1212_v13  ;;  %v1249_v17 = vcombine.low %v1221_v0, %v1228_v14  ;;  %v3367_v24 = vcombine.high %v1221_v0, %v1228_v14 }
 0x75c   : > { %v1240_v18 = vrot.slane %v1233_v15, %v4454_v45  ;;  %v1248_v19 = vrot.slane %v3366_v16, %v4454_v45  ;;  %v1256_v20 = vrot.slane %v1249_v17, %v4454_v45  ;;  %v1264_v21 = vrot.slane %v3367_v24, %v4454_v45 }
 0x75d   : > { %v2583_v45 = vmul.f32 %v3782_v27, %v4624_v50 }
 0x75e   : > { %v1265_v22 = vcombine.low %v1240_v18, %v1248_v19  ;;  %v1266_v23 = vcombine.high %v1240_v18, %v1248_v19  ;;  %v1281_v25 = vcombine.low %v1256_v20, %v1264_v21  ;;  %v1282_v26 = vcombine.high %v1256_v20, %v1264_v21 }
 0x760   : > { %v1273_v28 = vrot.slane %v1265_v22, %v4456_v52  ;;  %v1289_v30 = vrot.slane %v1281_v25, %v4456_v52  ;;  %v1280_v32 = vrot.slane %v1266_v23, %v4456_v52  ;;  %v1296_v35 = vrot.slane %v1282_v26, %v4456_v52 }
 0x761   : > { %v2584_v52 = vmul.f32 %v3786_v39, %v4629_v55 }
 0x762   : > { %v1297_v36 = vcombine.low %v1273_v28, %v1289_v30  ;;  %v1298_v38 = vcombine.high %v1273_v28, %v1289_v30  ;;  %v1299_v42 = vcombine.low %v1280_v32, %v1296_v35  ;;  %v1300_v43 = vcombine.high %v1280_v32, %v1296_v35 }
 0x764   : > { %3586 = vmatpush3.msra.mxu0 %v1297_v36  ;;  %3591 = vmatpush3.msra.mxu1 %v1298_v38 }
 0x765   : > { %3588 = vmatmul.mubr.msk.f32.vlgmr.msra.gmra.mrb[16].mxu0 %vm1593_vm2, %v2582_v40  ;;  %3593 = vmatmul.mubr.msk.f32.vlgmr.msra.gmra.mrb[18].mxu1 %vm1593_vm2, %v2583_v45 }
 0x766   : > { %3595 = vmatprep.subr.mxu0 %v4055_v1  ;;  %3600 = vmatprep.subr.mxu1 %v4055_v1 }
 0x767   : > { %3596 = vmatpush3.msra.mxu0 %v1299_v42  ;;  %3601 = vmatpush3.msra.mxu1 %v1300_v43 }
 0x768   : > { %3597 = vmatprep.mubr.msk.f32.mxu0 %vm4054_vm0, %v4055_v1  ;;  %3602 = vmatprep.mubr.msk.f32.mxu1 %vm4054_vm0, %v4055_v1 }
 0x769   : > { %3598 = vmatmul.mubr.msk.f32.vlgmr.msra.gmra.mrb[18].mxu0 %vm1593_vm2, %v2584_v52  ;;  %3603 = vmatmul.mubr.msk.f32.vlgmr.msra.gmra.mrb[20].mxu1 %vm1593_vm2, %v2585_v44 }
 0x76a   : > { %3605 = vmatprep.subr.mxu0 %v4055_v1  ;;  %3610 = vmatprep.subr.mxu1 %v4055_v1 }
 0x76b   : > { %3607 = vmatprep.mubr.msk.f32.mxu0 %vm4054_vm0, %v4055_v1  ;;  %3612 = vmatprep.mubr.msk.f32.mxu1 %vm4054_vm0, %v4055_v1 }
 0x76c   : > { %3606 = vmatpush3.msra.mxu0 %v2878_v46  ;;  %3611 = vmatpush3.msra.mxu1 %v2879_v47 }
 0x76d   : > { %3615 = vmatprep.subr.mxu0 %v4055_v1  ;;  %3620 = vmatprep.subr.mxu1 %v4055_v1 }
 0x838   : > { %v2655_v49 = vpop.f32.mrb[16].mxu0  ;;  %v2728_v50 = vpop.f32.mrb[18].mxu1 }
 0x839   : > { %v3589_v53 = vpop.f32.mrb[17].mxu0  ;;  %v3594_v54 = vpop.f32.mrb[19].mxu1  ;;  %3608 = vmatmul.mubr.msk.f32.vlgmr.msra.gmra.mrb[20].mxu0 %vm1593_vm2, %v2655_v49  ;;  %3613 = vmatmul.mubr.msk.f32.vlgmr.msra.gmra.mrb[22].mxu1 %vm1593_vm2, %v2728_v50 }
 0x83a   : > { %3616 = vmatpush3.msra.mxu0 %v2880_v48  ;;  %3617 = vmatprep.mubr.msk.f32.mxu0 %vm4054_vm0, %v4055_v1 }
 0x83b   : > { %3621 = vmatpush3.msra.mxu1 %v2881_v51  ;;  %3622 = vmatprep.mubr.msk.f32.mxu1 %vm4054_vm0, %v4055_v1 }
 0x83c   : > { %v2801_v55 = vpop.f32.mrb[18].mxu0  ;;  %v2874_v56 = vpop.f32.mrb[20].mxu1 }
 0x83d   : > { %v3599_v57 = vpop.f32.mrb[19].mxu0  ;;  %v3604_v58 = vpop.f32.mrb[21].mxu1  ;;  %3618 = vmatmul.mubr.msk.f32.vlgmr.msra.gmra.mrb[22].mxu0 %vm1593_vm2, %v2801_v55  ;;  %3623 = vmatmul.mubr.msk.f32.vlgmr.msra.gmra.mrb[24].mxu1 %vm1593_vm2, %v2874_v56 }
 0x90c   : > { %v2951_v59 = vpop.f32.mrb[20].mxu0  ;;  %v3024_v60 = vpop.f32.mrb[22].mxu1 }
 0x90d   : > { %v3174_v61 = vsel %vm483_vm1, %v2951_v59, 0.0  ;;  %v3175_v62 = vsel %vm483_vm1, %v3024_v60, 0.0  ;;  %v3609_v63 = vpop.f32.mrb[21].mxu0  ;;  %v3614_v2 = vpop.f32.mrb[23].mxu1 }
 0x90e   : > { %v3176_v3 = vadd.f32 %v3175_v62, %v3174_v61 }
 0x910   : > { %v3097_v1 = vpop.f32.mrb[22].mxu0  ;;  %v3170_v31 = vpop.f32.mrb[24].mxu1 }
 0x911   : > { %v3177_v33 = vsel %vm483_vm1, %v3097_v1, 0.0  ;;  %v3619_v4 = vpop.f32.mrb[23].mxu0  ;;  %v3624_v5 = vpop.f32.mrb[25].mxu1  ;;  %v3179_v7 = vsel %vm483_vm1, %v3170_v31, 0.0 }
 0x912   : > { %v3178_v6 = vadd.f32 %v3177_v33, %v3176_v3 }
 0x914   : > { %v3180_v37 = vadd.f32 %v3179_v7, %v3178_v6 }
 0x916   : > { %v3188_v8 = vadd.f32 %v3400_v34, %v3180_v37 }
 0x918   : > { %3189 = vst.msk [vmem:[%s469_s20] sm:$0xff] %vm483_vm1, %v3188_v8 }
 0x919   : > { %3974 = shalt.err (!%p3971_p6)
}
 0x91a   : > { %s3975_s25 = scalar_lea.hbm %s4700_s30, 128  ;;  %s3979_s17 = scalar_lea.hbm %s4790_s8, 256 }
 0x91b   : > { %p3976_p11 = scmp.ne.s32.totalorder %s4700_s30, %s3975_s25  ;;  %p3980_p12 = scmp.lt.u32.totalorder %s4700_s30, %s4790_s8 }
 0x91c   : > { %p3981_p3 = scmp.lt.u32.totalorder %s3979_s17, %s3975_s25  ;;  %p3983_p0 = scmp.lt.u32.totalorder %s3975_s25, %s4700_s30 }
 0x91d   : > { %p3977_p1 = pnand %p3976_p11, %p4791_p2 }
 0x91e   : > { %p3982_p13 = por %p3981_p3, %p3980_p12 }
 0x91f   : > { %p3978_p9 = pneg %p3977_p1 }
 0x920   : > { %p3984_p4 = por %p3983_p0, %p3982_p13 }
 0x922   : > { %p3985_p10 = pnand %p3984_p4, %p3978_p9 }
 0x924   : > { %3988 = shalt.err (!%p3985_p10)
}
 0x925   : > { %3675 = dma.vmem_to_hbm [thread:$0]  (%p4791_p2), %s4702_s10, 128, %s4700_s30, %s3191_s26  }
 0x926 PF: > { %s3216_s9 = sand.u32 1, %s4031_s13   ;;  %p4792_p5 = scmp.ne.s32.totalorder %s4779_s12, 0 }
 0x927   : > { %p4793_p7 = scmp.ge.s32.totalorder %s4043_s16, 2  ;;  %s3217_s2 = scalar_lea.sflag [#allocation4], %s3216_s9 }
 0x929   : > { %p3698_p8 = pnand %p4793_p7, %p4792_p5 }
 0x92b   : > { %4026 = dma.done.wait (!%p3698_p8), %s3217_s2, 128  }
 0x92c   : > { %4028 = vsyncadd (!%p3698_p8), %s3217_s2, 4294967168  ;;  %s4794_s20 = sld [smem:[#allocation20_spill]]  ;;  %p28_p6 = scmp.ge.s32.totalorder %s4269_s11, 4  }
 0x92d   : > { %s4795_s13 = smov %s4035_s14  ;;  %s4796_s14 = smov %s4039_s15 }
 0x92e   : > { %s4798_s16 = smov %s4269_s11  ;;  %30 = sbr.rel (!%p28_p6) target bundleno = 16 (0x10), region = 134 }
 0x932   : > { %s4797_s15 = smov %s4794_s20 }
 0x935   :  { %3222 = vsyncpa [#allocation3], 1 }
 0x936   :  { %3224 = vsyncpa [#allocation3 + $0x1], 1 }
 0x937   :  { %3225 = vsyncpa [#allocation6], 1 }
 0x938   :  { %3227 = vsyncpa [#allocation6 + $0x1], 1 }
 0x939   :  { %3228 = vsyncpa [#allocation9], 1 }
 0x93a   :  { %3229 = vsyncpa [#allocation12], 1 }
 0x93b   :  { %3230 = vsyncpa [#allocation4], 1 }
 0x93c   :  { %3232 = vsyncpa [#allocation4 + $0x1], 1 }

</bundles_post_ra>
